<compile_context>
chip_gen: v6e
topology: v6e:2x2x1
jax: 0.10.0
libtpu: 0.0.40
codegen_flags: <defaults>
</compile_context>

<pallas_src>
import functools

import jax
import jax.numpy as jnp
from jax import lax
from jax.experimental import pallas as pl
from jax.experimental.pallas import tpu as pltpu

# ----------------------------- configuration --------------------------------
V = 8                               # voxel grid resolution
V3 = V * V * V                      # 512 flattened voxels (x-major)
ROT_RES = 45.0                      # rotation_resolution
NUM_ROT = int(360 // ROT_RES)       # 8 rotation bins per axis
HID = 32                            # qnet hidden width
PROPRIO_DIM = 4
LANG_DIM = 32
PT_FEAT = 6                         # per-point features: xyz(3) + rgb(3)
F_SUM = PT_FEAT + 1                 # + ones row (count folded into matmul) = 7
F_ROWS = 8                          # + zero pad row -> full 8-sublane tile
CVOX = F_SUM + 3                    # mean xyz/rgb, occupancy, voxel pos = 10
ROT_GRIP_OUT = 3 * NUM_ROT + 2      # 26 per arm
HEAD_DIM = 2 * ROT_GRIP_OUT + 4     # rot/grip (both arms) + collisions = 56
HEAD_TOT = HEAD_DIM + HID           # + language embedding rows = 88
HEAD_PAD = 128                      # lane-dense pooled-head output width
SUB = 512                           # points per inner sub-tile (one-hot stays <=512 KiB)
MAX_CHUNK = 4096                    # points per grid step (amortizes ~0.35us step cost)


# --------------------- fused voxelizer + qnet kernel -------------------------
def _qfunction_kernel(idx_ref, feats_ref, pro_ref, lang_ref, pos_ref, pbias_ref,
                      wenc_ref, wpro_ref, wlang_ref, wtrans_ref, whead_ref,
                      vox_ref, trans_ref, feat_ref, head_ref,
                      acc_ref, *, chunk):
    # idx_ref  : (1, chunk, 1)    int32  flattened voxel id per point (V3 = padded)
    # feats_ref: (1, F_ROWS, chunk) f32  rows [x, y, z, r, g, b, 1, 0]
    # pro_ref  : (1, 1, PROPRIO_DIM), lang_ref : (1, 1, LANG_DIM)
    # pos_ref  : (3, V3) f32 normalized voxel positions
    # pbias_ref: (HID, V3) f32 precomputed w_enc[:,7:10] @ pos contribution
    # w*_ref   : transposed weights (channel-first math)
    # vox_ref  : (1, CVOX, V3), trans_ref: (1, 2, V3), feat_ref: (1, HID, V3)
    # head_ref : (1, HEAD_TOT, HEAD_PAD)   lane-broadcast pooled heads
    # acc_ref  : (F_ROWS, V3) f32 scratch accumulator
    k = pl.program_id(1)

    @pl.when(k == 0)
    def _():
        acc_ref[...] = jnp.zeros_like(acc_ref)

    # ---- scatter-accumulate this chunk: bf16 one-hot matmul, f32 accumulate --
    # Static Python loop over SUB-point sub-tiles (n_sub <= 8): keeps the
    # one-hot temporary small (512x512 bf16 = 512 KiB) and fully unrolled for
    # the LLO scheduler.  Compare stays in int32 (v5e has no bf16 VALU); only
    # the 0/1 result is cast at the matmul boundary.
    n_sub = chunk // SUB
    for t in range(n_sub):
        lo = t * SUB
        idx = idx_ref[0, lo:lo + SUB, :]                              # (SUB, 1) i32
        f = feats_ref[0, :, lo:lo + SUB]                              # (F_ROWS, SUB)
        vox_iota = lax.broadcasted_iota(jnp.int32, (SUB, V3), 1)
        onehot = (vox_iota == idx).astype(jnp.bfloat16)               # (SUB, V3)
        acc_ref[...] += jnp.dot(f.astype(jnp.bfloat16), onehot,
                                preferred_element_type=jnp.float32)

    # ---- finalize voxel grid + run qnet stand-in at the last chunk ----------
    @pl.when(k == pl.num_programs(1) - 1)
    def _():
        acc = acc_ref[...]                                            # (F_ROWS, V3)
        cnt = acc[PT_FEAT:F_SUM, :]                                   # (1, V3) exact
        # Exact division (matches torch VoxelGrid mean); row 6 becomes
        # cnt/max(cnt,1) == occupancy exactly since cnt is an exact integer.
        top7 = acc[0:F_SUM, :] / jnp.maximum(cnt, 1.0)                # (7, V3)
        vox_ref[0, 0:F_SUM, :] = top7
        vox_ref[0, F_SUM:CVOX, :] = pos_ref[...]

        # qnet stand-in (channel-first): biases as columns, heads lane-dense.
        lang_e = jnp.sum(wlang_ref[...] * lang_ref[0], axis=1, keepdims=True)  # (HID,1)
        pro_e = jnp.sum(wpro_ref[...] * pro_ref[0], axis=1, keepdims=True)     # (HID,1)
        # Feed the register-resident top7 straight into the encoder matmul;
        # positional contribution comes from the precomputed constant bias.
        h = jnp.dot(wenc_ref[...], top7, preferred_element_type=jnp.float32)   # (HID,V3)
        h = jnp.maximum(h + pbias_ref[...] + lang_e + pro_e, 0.0)
        feat_ref[0] = h
        trans_ref[0] = jnp.dot(wtrans_ref[...], h,
                               preferred_element_type=jnp.float32)             # (2, V3)
        rc = jnp.dot(whead_ref[...], h, preferred_element_type=jnp.float32)    # (56, V3)
        pooled = jnp.mean(rc, axis=1, keepdims=True)                           # (56, 1)
        # Lane-broadcast the tiny columns so the head writeback is unmasked.
        head_ref[0, 0:HEAD_DIM, :] = jnp.broadcast_to(pooled, (HEAD_DIM, HEAD_PAD))
        head_ref[0, HEAD_DIM:HEAD_TOT, :] = jnp.broadcast_to(lang_e, (HID, HEAD_PAD))


def _fused_voxelize_qnet(params, pcd_flat, feat_flat, bounds, proprio, lang_goal_emb):
    """pcd_flat/feat_flat: (B, N, 3); bounds: (B, 6) -> channel-first outputs."""
    b, n, _ = pcd_flat.shape
    pcd_flat = pcd_flat.astype(jnp.float32)
    feat_flat = feat_flat.astype(jnp.float32)

    # flattened voxel index per point (x-major); out-of-bounds clipped to edge
    # voxels (the torch voxelizer clamps coords to the bounding box as well).
    bmin = bounds[:, :3][:, None, :]
    res = (bounds[:, 3:] - bounds[:, :3])[:, None, :] / float(V)
    ind = jnp.clip(jnp.floor((pcd_flat - bmin) / res).astype(jnp.int32), 0, V - 1)
    flat_idx = ind[..., 0] * (V * V) + ind[..., 1] * V + ind[..., 2]     # (B, N)

    ones = jnp.ones((b, n, 1), jnp.float32)
    zeros = jnp.zeros((b, n, 1), jnp.float32)
    feats_aug = jnp.concatenate([pcd_flat, feat_flat, ones, zeros], axis=-1)  # (B,N,8)

    # chunk the point axis (multiple of SUB); pad with idx=V3 / zero features
    chunk = min(MAX_CHUNK, -(-n // SUB) * SUB)
    n_pad = -(-n // chunk) * chunk
    n_chunks = n_pad // chunk
    if n_pad != n:
        feats_aug = jnp.pad(feats_aug, ((0, 0), (0, n_pad - n), (0, 0)))
        flat_idx = jnp.pad(flat_idx, ((0, 0), (0, n_pad - n)), constant_values=V3)

    feats_cf = jnp.transpose(feats_aug, (0, 2, 1))        # (B, F_ROWS, n_pad)
    idx_col = flat_idx[..., None].astype(jnp.int32)       # (B, n_pad, 1) sublane-major
    pro_row = proprio[:, None, :].astype(jnp.float32)     # (B, 1, PROPRIO_DIM)
    lang_row = lang_goal_emb[:, None, :].astype(jnp.float32)  # (B, 1, LANG_DIM)

    # constant normalized voxel-position channels + their w_enc contribution
    vid = jnp.arange(V3, dtype=jnp.int32)
    pos = jnp.stack([vid // (V * V), (vid // V) % V, vid % V], axis=0)
    pos = pos.astype(jnp.float32) / float(V - 1)                       # (3, V3)

    w_enc = params["w_enc"].astype(jnp.float32)                        # (CVOX, HID)
    w_enc7_t = w_enc[0:F_SUM, :].T                                     # (HID, 7)
    pos_bias = jnp.dot(w_enc[F_SUM:CVOX, :].T, pos)                    # (HID, V3)
    w_pro_t = params["w_pro"].T                                        # (HID, PROPRIO_DIM)
    w_lang_t = params["w_lang"].T                                      # (HID, LANG_DIM)
    w_trans_t = params["w_trans"].T                                    # (2, HID)
    w_head_t = jnp.concatenate([params["w_rot"].T, params["w_col"].T], axis=0)  # (56, HID)

    kernel = functools.partial(_qfunction_kernel, chunk=chunk)
    vox_cf, trans_cf, feat_cf, head = pl.pallas_call(
        kernel,
        out_shape=(
            jax.ShapeDtypeStruct((b, CVOX, V3), jnp.float32),
            jax.ShapeDtypeStruct((b, 2, V3), jnp.float32),
            jax.ShapeDtypeStruct((b, HID, V3), jnp.float32),
            jax.ShapeDtypeStruct((b, HEAD_TOT, HEAD_PAD), jnp.float32),
        ),
        grid_spec=pltpu.PrefetchScalarGridSpec(
            num_scalar_prefetch=0,
            grid=(b, n_chunks),
            in_specs=[
                pl.BlockSpec((1, chunk, 1), lambda i, k: (i, k, 0)),
                pl.BlockSpec((1, F_ROWS, chunk), lambda i, k: (i, 0, k)),
                pl.BlockSpec((1, 1, PROPRIO_DIM), lambda i, k: (i, 0, 0)),
                pl.BlockSpec((1, 1, LANG_DIM), lambda i, k: (i, 0, 0)),
                pl.BlockSpec((3, V3), lambda i, k: (0, 0)),
                pl.BlockSpec((HID, V3), lambda i, k: (0, 0)),
                pl.BlockSpec((HID, F_SUM), lambda i, k: (0, 0)),
                pl.BlockSpec((HID, PROPRIO_DIM), lambda i, k: (0, 0)),
                pl.BlockSpec((HID, LANG_DIM), lambda i, k: (0, 0)),
                pl.BlockSpec((2, HID), lambda i, k: (0, 0)),
                pl.BlockSpec((HEAD_DIM, HID), lambda i, k: (0, 0)),
            ],
            out_specs=(
                pl.BlockSpec((1, CVOX, V3), lambda i, k: (i, 0, 0)),
                pl.BlockSpec((1, 2, V3), lambda i, k: (i, 0, 0)),
                pl.BlockSpec((1, HID, V3), lambda i, k: (i, 0, 0)),
                pl.BlockSpec((1, HEAD_TOT, HEAD_PAD), lambda i, k: (i, 0, 0)),
            ),
            scratch_shapes=[pltpu.VMEM((F_ROWS, V3), jnp.float32)],
        ),
        compiler_params=pltpu.CompilerParams(
            dimension_semantics=("parallel", "arbitrary"),   # batch split across v7x TCs
            vmem_limit_bytes=32 * 1024 * 1024,               # ~8 MiB live at chunk=4096
        ),
    )(idx_col, feats_cf, pro_row, lang_row, pos, pos_bias,
      w_enc7_t, w_pro_t, w_lang_t, w_trans_t, w_head_t)
    return vox_cf, trans_cf, feat_cf, head


# ----------------------------- action selection -------------------------------
def _argmax_3d(q):
    """q: (b, c, d, h, w) -> (b, 3*c) indices, exactly mirroring the torch code.

    Uses plain XLA argmax: a separate pallas_call for ~4 KB of data would be
    dominated by launch/DMA overhead.
    """
    b, c, d, h, w = q.shape
    idxs = jnp.argmax(q.reshape(b, c, d * h * w), axis=-1).astype(jnp.int32)   # (b, c)
    indices = jnp.concatenate([idxs // h // d, idxs // h % w, idxs % w], axis=1)
    return indices


def choose_highest_action(q_trans, q_rot_grip, q_collision, rotation_resolution=ROT_RES):
    coords = _argmax_3d(q_trans)
    rot_and_grip_indicies = None
    ignore_collision = None
    if q_rot_grip is not None:
        nrot = int(360 // rotation_resolution)
        b = q_rot_grip.shape[0]
        q_rot = q_rot_grip[:, :-2].reshape(b, 3, nrot)
        rot_idx = jnp.argmax(q_rot, axis=-1).astype(jnp.int32)                   # (b, 3)
        grip_idx = jnp.argmax(q_rot_grip[:, -2:], axis=-1, keepdims=True).astype(jnp.int32)
        rot_and_grip_indicies = jnp.concatenate([rot_idx, grip_idx], axis=-1)
        ignore_collision = jnp.argmax(q_collision[:, -2:], axis=-1,
                                      keepdims=True).astype(jnp.int32)
    return coords, rot_and_grip_indicies, ignore_collision


# ----------------------------- QFunction.forward -----------------------------
def qfunction_forward(params, rgb_pcd, depth, proprio, pcd, camera_extrinsics,
                      camera_intrinsics, lang_goal_emb, lang_token_embs,
                      bounds=None, use_neural_rendering=False):
    del depth, camera_extrinsics, camera_intrinsics  # only used by renderer branch
    # TODO(synk): lang_token_embs feeds the real PerceiverIO cross-attention;
    # the stand-in qnet only consumes lang_goal_emb.
    del lang_token_embs
    b = rgb_pcd[0][0].shape[0]

    pcd_flat = jnp.concatenate(
        [jnp.transpose(p, (0, 2, 3, 1)).reshape(b, -1, 3) for p in pcd], axis=1)
    rgb = [rp[0] for rp in rgb_pcd]
    feat_size = rgb[0].shape[1]
    flat_imag_features = jnp.concatenate(
        [jnp.transpose(p, (0, 2, 3, 1)).reshape(b, -1, feat_size) for p in rgb], axis=1)

    bounds_b = jnp.tile(bounds, (b, 1)) if bounds.shape[0] != b else bounds

    vox_cf, trans_cf, feat_cf, head = _fused_voxelize_qnet(
        params, pcd_flat, flat_imag_features, bounds_b, proprio, lang_goal_emb)

    # channel-first slab -> NCDHW is a pure reshape (no XLA transpose)
    voxel_grid = vox_cf.reshape(b, CVOX, V, V, V)

    right_trans = trans_cf[:, 0:1, :].reshape(b, 1, V, V, V)
    left_trans = trans_cf[:, 1:2, :].reshape(b, 1, V, V, V)
    head2 = head[:, :, 0]                                            # (B, HEAD_TOT)
    right_rot_and_grip = head2[:, :ROT_GRIP_OUT]
    left_rot_and_grip_out = head2[:, ROT_GRIP_OUT:2 * ROT_GRIP_OUT]
    right_ignore_collisions = head2[:, 2 * ROT_GRIP_OUT:2 * ROT_GRIP_OUT + 2]
    left_collision_out = head2[:, 2 * ROT_GRIP_OUT + 2:2 * ROT_GRIP_OUT + 4]
    lang_embedd = head2[:, HEAD_DIM:]
    voxel_grid_feature = feat_cf.reshape(b, HID, V, V, V)

    split_pred = (right_trans, right_rot_and_grip, right_ignore_collisions,
                  left_trans, left_rot_and_grip_out, left_collision_out)

    # Computed (but not returned) exactly like the torch forward.
    q_trans = jnp.concatenate((right_trans, left_trans), axis=1)
    q_rot_and_grip = jnp.concatenate((right_rot_and_grip, left_rot_and_grip_out), axis=1)
    q_ignore_collisions = jnp.concatenate((right_ignore_collisions, left_collision_out), axis=1)
    del q_trans, q_rot_and_grip, q_ignore_collisions, voxel_grid_feature, lang_embedd

    rendering_loss_dict = {}
    # TODO(synk): use_neural_rendering=True path (NeuralRenderer) not implemented.
    return split_pred, voxel_grid, rendering_loss_dict


# ----------------------------- params ----------------------------------------
def init_params(key):
    ks = jax.random.split(key, 6)
    s = 0.02
    return {
        "w_enc": (jax.random.normal(ks[0], (CVOX, HID)) * s).astype(jnp.float32),
        "w_pro": (jax.random.normal(ks[1], (PROPRIO_DIM, HID)) * s).astype(jnp.float32),
        "w_lang": (jax.random.normal(ks[2], (LANG_DIM, HID)) * s).astype(jnp.float32),
        "w_trans": (jax.random.normal(ks[3], (HID, 2)) * s).astype(jnp.float32),
        "w_rot": (jax.random.normal(ks[4], (HID, 2 * ROT_GRIP_OUT)) * s).astype(jnp.float32),
        "w_col": (jax.random.normal(ks[5], (HID, 4)) * s).astype(jnp.float32),
    }


# ----------------------------- demo -------------------------------------------
if __name__ == "__main__":
    key = jax.random.PRNGKey(0)
    B, H, W = 2, 16, 16
    n_cams = 2
    keys = jax.random.split(key, 12)

    rgb = [jax.random.normal(keys[i], (B, 3, H, W), jnp.float32) for i in range(n_cams)]
    pcd = [jax.random.uniform(keys[2 + i], (B, 3, H, W), jnp.float32,
                              minval=-1.0, maxval=1.0) for i in range(n_cams)]
    rgb_pcd = [(rgb[i], pcd[i]) for i in range(n_cams)]
    depth = [jax.random.uniform(keys[4 + i], (B, 1, H, W), jnp.float32)
             for i in range(n_cams)]
    proprio = jax.random.normal(keys[6], (B, PROPRIO_DIM), jnp.float32)
    lang_goal_emb = jax.random.normal(keys[7], (B, LANG_DIM), jnp.float32)
    lang_token_embs = jax.random.normal(keys[8], (B, 8, LANG_DIM), jnp.float32)
    camera_extrinsics = [jnp.tile(jnp.eye(4, dtype=jnp.float32)[None], (B, 1, 1))
                         for _ in range(n_cams)]
    camera_intrinsics = [jnp.tile(jnp.array([[120.0, 0.0, 64.0],
                                             [0.0, 120.0, 64.0],
                                             [0.0, 0.0, 1.0]], jnp.float32)[None],
                                  (B, 1, 1)) for _ in range(n_cams)]
    bounds = jnp.array([[-1.0, -1.0, -1.0, 1.0, 1.0, 1.0]], jnp.float32)

    params = init_params(jax.random.PRNGKey(42))

    split_pred, voxel_grid, rendering_loss_dict = qfunction_forward(
        params, rgb_pcd, depth, proprio, pcd, camera_extrinsics,
        camera_intrinsics, lang_goal_emb, lang_token_embs, bounds=bounds,
        use_neural_rendering=False)

    (right_trans, right_rot_and_grip, right_ignore_collisions,
     left_trans, left_rot_and_grip_out, left_collision_out) = split_pred

    q_trans = jnp.concatenate((right_trans, left_trans), axis=1)
    coords, rot_grip_idx, ignore_col_idx = choose_highest_action(
        q_trans, right_rot_and_grip, right_ignore_collisions)

    jax.block_until_ready((split_pred, voxel_grid, coords, rot_grip_idx, ignore_col_idx))

    assert voxel_grid.shape == (B, CVOX, V, V, V)
    assert right_trans.shape == (B, 1, V, V, V)
    assert right_rot_and_grip.shape == (B, ROT_GRIP_OUT)
    assert right_ignore_collisions.shape == (B, 2)
    assert coords.shape == (B, 6)                 # 2 trans channels * 3 coords
    assert rot_grip_idx.shape == (B, 4)
    assert ignore_col_idx.shape == (B, 1)
    print("KERNEL_OK")
</pallas_src>

<mosaic_0001>
module attributes {stable_mosaic.version = 11 : i64} {
  func.func @_qfunction_kernel(%arg0: i32, %arg1: i32, %arg2: memref<1x512x1xi32, #tpu.memory_space<vmem>>, %arg3: memref<1x8x512xf32, #tpu.memory_space<vmem>>, %arg4: memref<1x1x4xf32, #tpu.memory_space<vmem>>, %arg5: memref<1x1x32xf32, #tpu.memory_space<vmem>>, %arg6: memref<3x512xf32, #tpu.memory_space<vmem>>, %arg7: memref<32x512xf32, #tpu.memory_space<vmem>>, %arg8: memref<32x7xf32, #tpu.memory_space<vmem>>, %arg9: memref<32x4xf32, #tpu.memory_space<vmem>>, %arg10: memref<32x32xf32, #tpu.memory_space<vmem>>, %arg11: memref<2x32xf32, #tpu.memory_space<vmem>>, %arg12: memref<56x32xf32, #tpu.memory_space<vmem>>, %arg13: memref<1x10x512xf32, #tpu.memory_space<vmem>>, %arg14: memref<1x2x512xf32, #tpu.memory_space<vmem>>, %arg15: memref<1x32x512xf32, #tpu.memory_space<vmem>>, %arg16: memref<1x88x128xf32, #tpu.memory_space<vmem>>, %arg17: memref<8x512xf32, #tpu.memory_space<vmem>>) attributes {dimension_semantics = [#tpu.dimension_semantics<parallel>, #tpu.dimension_semantics<arbitrary>], iteration_bounds = array<i64: 2, 1>, scalar_prefetch = 0 : i64, scratch_operands = 1 : i64, tpu.core_type = #tpu.core_type<tc>, window_params = [{transform_indices = @transform_0, window_bounds = array<i64: 1, 512, 1>}, {transform_indices = @transform_1, window_bounds = array<i64: 1, 8, 512>}, {transform_indices = @transform_2, window_bounds = array<i64: 1, 1, 4>}, {transform_indices = @transform_3, window_bounds = array<i64: 1, 1, 32>}, {pipeline_mode = #tpu.pipeline_mode<synchronous>, transform_indices = @transform_4, window_bounds = array<i64: 3, 512>}, {pipeline_mode = #tpu.pipeline_mode<synchronous>, transform_indices = @transform_5, window_bounds = array<i64: 32, 512>}, {pipeline_mode = #tpu.pipeline_mode<synchronous>, transform_indices = @transform_6, window_bounds = array<i64: 32, 7>}, {pipeline_mode = #tpu.pipeline_mode<synchronous>, transform_indices = @transform_7, window_bounds = array<i64: 32, 4>}, {pipeline_mode = #tpu.pipeline_mode<synchronous>, transform_indices = @transform_8, window_bounds = array<i64: 32, 32>}, {pipeline_mode = #tpu.pipeline_mode<synchronous>, transform_indices = @transform_9, window_bounds = array<i64: 2, 32>}, {pipeline_mode = #tpu.pipeline_mode<synchronous>, transform_indices = @transform_10, window_bounds = array<i64: 56, 32>}, {transform_indices = @transform_11, window_bounds = array<i64: 1, 10, 512>}, {transform_indices = @transform_12, window_bounds = array<i64: 1, 2, 512>}, {transform_indices = @transform_13, window_bounds = array<i64: 1, 32, 512>}, {transform_indices = @transform_14, window_bounds = array<i64: 1, 88, 128>}]} {
    %c0_i32 = arith.constant 0 : i32
    %0 = arith.cmpi eq, %arg1, %c0_i32 : i32
    %1 = arith.extui %0 : i1 to i32
    %c0_i32_0 = arith.constant 0 : i32
    %2 = arith.cmpi ne, %1, %c0_i32_0 : i32
    scf.if %2 {
      %cst_12 = arith.constant 0.000000e+00 : f32
      %21 = vector.broadcast %cst_12 : f32 to vector<8x512xf32>
      %c0_13 = arith.constant 0 : index
      %c0_14 = arith.constant 0 : index
      %22 = vector.load %arg17[%c0_13, %c0_14] : memref<8x512xf32, #tpu.memory_space<vmem>>, vector<8x512xf32>
      tpu.vector_store %arg17[%c0_13, %c0_14], %21 {strides = array<i32>} : memref<8x512xf32, #tpu.memory_space<vmem>>, vector<8x512xf32>,
    } else {
    }
    %c0 = arith.constant 0 : index
    %c0_1 = arith.constant 0 : index
    %c0_2 = arith.constant 0 : index
    %3 = vector.load %arg2[%c0, %c0_1, %c0_2] : memref<1x512x1xi32, #tpu.memory_space<vmem>>, vector<1x512x1xi32>
    %4 = vector.shape_cast %3 : vector<1x512x1xi32> to vector<512x1xi32>
    %c0_3 = arith.constant 0 : index
    %c0_4 = arith.constant 0 : index
    %c0_5 = arith.constant 0 : index
    %5 = vector.load %arg3[%c0_3, %c0_4, %c0_5] : memref<1x8x512xf32, #tpu.memory_space<vmem>>, vector<1x8x512xf32>
    %6 = vector.shape_cast %5 : vector<1x8x512xf32> to vector<8x512xf32>
    %7 = tpu.iota {dimensions = array<i32: 1>} : vector<512x512xi32>
    %8 = vector.broadcast %4 : vector<512x1xi32> to vector<512x512xi32>
    %9 = arith.cmpi eq, %7, %8 : vector<512x512xi32>
    %10 = arith.extui %9 : vector<512x512xi1> to vector<512x512xi32>
    %11 = arith.sitofp %10 : vector<512x512xi32> to vector<512x512xf32>
    %12 = arith.truncf %11 : vector<512x512xf32> to vector<512x512xbf16>
    %c0_6 = arith.constant 0 : index
    %c0_7 = arith.constant 0 : index
    %13 = vector.load %arg17[%c0_6, %c0_7] : memref<8x512xf32, #tpu.memory_space<vmem>>, vector<8x512xf32>
    %14 = arith.truncf %6 : vector<8x512xf32> to vector<8x512xbf16>
    %cst = arith.constant dense<0.000000e+00> : vector<8x512xf32>
    %15 = tpu.matmul %14, %12, %cst {dimension_numbers = #tpu.dot_dimension_numbers<[1], [0], [0], [1], [0, 0, 1, 1], [], []>} : vector<8x512xbf16>, vector<512x512xbf16>, vector<8x512xf32> -> vector<8x512xf32>
    %16 = arith.addf %13, %15 : vector<8x512xf32>
    %c0_8 = arith.constant 0 : index
    %c0_9 = arith.constant 0 : index
    %17 = vector.load %arg17[%c0_8, %c0_9] : memref<8x512xf32, #tpu.memory_space<vmem>>, vector<8x512xf32>
    tpu.vector_store %arg17[%c0_8, %c0_9], %16 {strides = array<i32>} : memref<8x512xf32, #tpu.memory_space<vmem>>, vector<8x512xf32>,
    %c0_i32_10 = arith.constant 0 : i32
    %18 = arith.cmpi eq, %arg1, %c0_i32_10 : i32
    %19 = arith.extui %18 : i1 to i32
    %c0_i32_11 = arith.constant 0 : i32
    %20 = arith.cmpi ne, %19, %c0_i32_11 : i32
    scf.if %20 {
      %c0_12 = arith.constant 0 : index
      %c0_13 = arith.constant 0 : index
      %21 = vector.load %arg17[%c0_12, %c0_13] : memref<8x512xf32, #tpu.memory_space<vmem>>, vector<8x512xf32>
      %22 = vector.extract_strided_slice %21 {offsets = [6, 0], sizes = [1, 512], strides = [1, 1]} : vector<8x512xf32> to vector<1x512xf32>
      %23 = vector.extract_strided_slice %21 {offsets = [0, 0], sizes = [7, 512], strides = [1, 1]} : vector<8x512xf32> to vector<7x512xf32>
      %cst_14 = arith.constant 1.000000e+00 : f32
      %24 = vector.broadcast %cst_14 : f32 to vector<1x512xf32>
      %25 = arith.maximumf %22, %24 : vector<1x512xf32>
      %26 = vector.broadcast %25 : vector<1x512xf32> to vector<7x512xf32>
      %27 = arith.divf %23, %26 : vector<7x512xf32>
      %c0_15 = arith.constant 0 : index
      %c0_16 = arith.constant 0 : index
      %c0_17 = arith.constant 0 : index
      %28 = vector.load %arg13[%c0_15, %c0_16, %c0_17] : memref<1x10x512xf32, #tpu.memory_space<vmem>>, vector<1x7x512xf32>
      %29 = vector.shape_cast %28 : vector<1x7x512xf32> to vector<7x512xf32>
      %30 = vector.shape_cast %27 : vector<7x512xf32> to vector<1x7x512xf32>
      tpu.vector_store %arg13[%c0_15, %c0_16, %c0_17], %30 {strides = array<i32>} : memref<1x10x512xf32, #tpu.memory_space<vmem>>, vector<1x7x512xf32>,
      %c0_18 = arith.constant 0 : index
      %c0_19 = arith.constant 0 : index
      %31 = vector.load %arg6[%c0_18, %c0_19] : memref<3x512xf32, #tpu.memory_space<vmem>>, vector<3x512xf32>
      %c0_20 = arith.constant 0 : index
      %c7 = arith.constant 7 : index
      %c0_21 = arith.constant 0 : index
      %32 = vector.load %arg13[%c0_20, %c7, %c0_21] : memref<1x10x512xf32, #tpu.memory_space<vmem>>, vector<1x3x512xf32>
      %33 = vector.shape_cast %32 : vector<1x3x512xf32> to vector<3x512xf32>
      %34 = vector.shape_cast %31 : vector<3x512xf32> to vector<1x3x512xf32>
      tpu.vector_store %arg13[%c0_20, %c7, %c0_21], %34 {strides = array<i32>} : memref<1x10x512xf32, #tpu.memory_space<vmem>>, vector<1x3x512xf32>,
      %c0_22 = arith.constant 0 : index
      %c0_23 = arith.constant 0 : index
      %35 = vector.load %arg10[%c0_22, %c0_23] : memref<32x32xf32, #tpu.memory_space<vmem>>, vector<32x32xf32>
      %c0_24 = arith.constant 0 : index
      %c0_25 = arith.constant 0 : index
      %c0_26 = arith.constant 0 : index
      %36 = vector.load %arg5[%c0_24, %c0_25, %c0_26] : memref<1x1x32xf32, #tpu.memory_space<vmem>>, vector<1x1x32xf32>
      %37 = vector.shape_cast %36 : vector<1x1x32xf32> to vector<1x32xf32>
      %38 = vector.broadcast %37 : vector<1x32xf32> to vector<32x32xf32>
      %39 = arith.mulf %35, %38 : vector<32x32xf32>
      %cst_27 = arith.constant dense<0.000000e+00> : vector<32xf32>
      %40 = vector.multi_reduction <add>, %39, %cst_27 [1] : vector<32x32xf32> to vector<32xf32>
      %41 = vector.shape_cast %40 : vector<32xf32> to vector<32x1xf32>
      %c0_28 = arith.constant 0 : index
      %c0_29 = arith.constant 0 : index
      %42 = vector.load %arg9[%c0_28, %c0_29] : memref<32x4xf32, #tpu.memory_space<vmem>>, vector<32x4xf32>
      %c0_30 = arith.constant 0 : index
      %c0_31 = arith.constant 0 : index
      %c0_32 = arith.constant 0 : index
      %43 = vector.load %arg4[%c0_30, %c0_31, %c0_32] : memref<1x1x4xf32, #tpu.memory_space<vmem>>, vector<1x1x4xf32>
      %44 = vector.shape_cast %43 : vector<1x1x4xf32> to vector<1x4xf32>
      %45 = vector.broadcast %44 : vector<1x4xf32> to vector<32x4xf32>
      %46 = arith.mulf %42, %45 : vector<32x4xf32>
      %cst_33 = arith.constant dense<0.000000e+00> : vector<32xf32>
      %47 = vector.multi_reduction <add>, %46, %cst_33 [1] : vector<32x4xf32> to vector<32xf32>
      %48 = vector.shape_cast %47 : vector<32xf32> to vector<32x1xf32>
      %c0_34 = arith.constant 0 : index
      %c0_35 = arith.constant 0 : index
      %49 = vector.load %arg8[%c0_34, %c0_35] : memref<32x7xf32, #tpu.memory_space<vmem>>, vector<32x7xf32>
      %cst_36 = arith.constant dense<0.000000e+00> : vector<32x512xf32>
      %50 = tpu.matmul %49, %27, %cst_36 {dimension_numbers = #tpu.dot_dimension_numbers<[1], [0], [0], [1], [0, 0, 1, 1], [], []>} : vector<32x7xf32>, vector<7x512xf32>, vector<32x512xf32> -> vector<32x512xf32>
      %c0_37 = arith.constant 0 : index
      %c0_38 = arith.constant 0 : index
      %51 = vector.load %arg7[%c0_37, %c0_38] : memref<32x512xf32, #tpu.memory_space<vmem>>, vector<32x512xf32>
      %52 = arith.addf %50, %51 : vector<32x512xf32>
      %53 = vector.broadcast %41 : vector<32x1xf32> to vector<32x512xf32>
      %54 = arith.addf %52, %53 : vector<32x512xf32>
      %55 = vector.broadcast %48 : vector<32x1xf32> to vector<32x512xf32>
      %56 = arith.addf %54, %55 : vector<32x512xf32>
      %cst_39 = arith.constant 0.000000e+00 : f32
      %57 = vector.broadcast %cst_39 : f32 to vector<32x512xf32>
      %58 = arith.maximumf %56, %57 : vector<32x512xf32>
      %c0_40 = arith.constant 0 : index
      %c0_41 = arith.constant 0 : index
      %c0_42 = arith.constant 0 : index
      %59 = vector.load %arg15[%c0_40, %c0_41, %c0_42] : memref<1x32x512xf32, #tpu.memory_space<vmem>>, vector<1x32x512xf32>
      %60 = vector.shape_cast %59 : vector<1x32x512xf32> to vector<32x512xf32>
      %61 = vector.shape_cast %58 : vector<32x512xf32> to vector<1x32x512xf32>
      tpu.vector_store %arg15[%c0_40, %c0_41, %c0_42], %61 {strides = array<i32>} : memref<1x32x512xf32, #tpu.memory_space<vmem>>, vector<1x32x512xf32>,
      %c0_43 = arith.constant 0 : index
      %c0_44 = arith.constant 0 : index
      %62 = vector.load %arg11[%c0_43, %c0_44] : memref<2x32xf32, #tpu.memory_space<vmem>>, vector<2x32xf32>
      %cst_45 = arith.constant dense<0.000000e+00> : vector<2x512xf32>
      %63 = tpu.matmul %62, %58, %cst_45 {dimension_numbers = #tpu.dot_dimension_numbers<[1], [0], [0], [1], [0, 0, 1, 1], [], []>} : vector<2x32xf32>, vector<32x512xf32>, vector<2x512xf32> -> vector<2x512xf32>
      %c0_46 = arith.constant 0 : index
      %c0_47 = arith.constant 0 : index
      %c0_48 = arith.constant 0 : index
      %64 = vector.load %arg14[%c0_46, %c0_47, %c0_48] : memref<1x2x512xf32, #tpu.memory_space<vmem>>, vector<1x2x512xf32>
      %65 = vector.shape_cast %64 : vector<1x2x512xf32> to vector<2x512xf32>
      %66 = vector.shape_cast %63 : vector<2x512xf32> to vector<1x2x512xf32>
      tpu.vector_store %arg14[%c0_46, %c0_47, %c0_48], %66 {strides = array<i32>} : memref<1x2x512xf32, #tpu.memory_space<vmem>>, vector<1x2x512xf32>,
      %c0_49 = arith.constant 0 : index
      %c0_50 = arith.constant 0 : index
      %67 = vector.load %arg12[%c0_49, %c0_50] : memref<56x32xf32, #tpu.memory_space<vmem>>, vector<56x32xf32>
      %cst_51 = arith.constant dense<0.000000e+00> : vector<56x512xf32>
      %68 = tpu.matmul %67, %58, %cst_51 {dimension_numbers = #tpu.dot_dimension_numbers<[1], [0], [0], [1], [0, 0, 1, 1], [], []>} : vector<56x32xf32>, vector<32x512xf32>, vector<56x512xf32> -> vector<56x512xf32>
      %cst_52 = arith.constant dense<0.000000e+00> : vector<56xf32>
      %69 = vector.multi_reduction <add>, %68, %cst_52 [1] : vector<56x512xf32> to vector<56xf32>
      %70 = vector.shape_cast %69 : vector<56xf32> to vector<56x1xf32>
      %cst_53 = arith.constant 5.120000e+02 : f32
      %71 = vector.broadcast %cst_53 : f32 to vector<56x1xf32>
      %72 = arith.divf %70, %71 : vector<56x1xf32>
      %73 = vector.shape_cast %72 : vector<56x1xf32> to vector<56x1xf32>
      %74 = vector.broadcast %73 : vector<56x1xf32> to vector<56x128xf32>
      %c0_54 = arith.constant 0 : index
      %c0_55 = arith.constant 0 : index
      %c0_56 = arith.constant 0 : index
      %75 = vector.load %arg16[%c0_54, %c0_55, %c0_56] : memref<1x88x128xf32, #tpu.memory_space<vmem>>, vector<1x56x128xf32>
      %76 = vector.shape_cast %75 : vector<1x56x128xf32> to vector<56x128xf32>
      %77 = vector.shape_cast %74 : vector<56x128xf32> to vector<1x56x128xf32>
      tpu.vector_store %arg16[%c0_54, %c0_55, %c0_56], %77 {strides = array<i32>} : memref<1x88x128xf32, #tpu.memory_space<vmem>>, vector<1x56x128xf32>,
      %78 = vector.shape_cast %41 : vector<32x1xf32> to vector<32x1xf32>
      %79 = vector.broadcast %78 : vector<32x1xf32> to vector<32x128xf32>
      %c0_57 = arith.constant 0 : index
      %c56 = arith.constant 56 : index
      %c0_58 = arith.constant 0 : index
      %80 = vector.load %arg16[%c0_57, %c56, %c0_58] : memref<1x88x128xf32, #tpu.memory_space<vmem>>, vector<1x32x128xf32>
      %81 = vector.shape_cast %80 : vector<1x32x128xf32> to vector<32x128xf32>
      %82 = vector.shape_cast %79 : vector<32x128xf32> to vector<1x32x128xf32>
      tpu.vector_store %arg16[%c0_57, %c56, %c0_58], %82 {strides = array<i32>} : memref<1x88x128xf32, #tpu.memory_space<vmem>>, vector<1x32x128xf32>,
    } else {
    }
    return
  }
  func.func @transform_0(%arg0: i32, %arg1: i32) -> (i32, i32, i32) {
    %c0_i32 = arith.constant 0 : i32
    %c0_i32_0 = arith.constant 0 : i32
    return %arg0, %arg1, %c0_i32 : i32, i32, i32
  }
  func.func @transform_1(%arg0: i32, %arg1: i32) -> (i32, i32, i32) {
    %c0_i32 = arith.constant 0 : i32
    %c0_i32_0 = arith.constant 0 : i32
    return %arg0, %c0_i32, %arg1 : i32, i32, i32
  }
  func.func @transform_2(%arg0: i32, %arg1: i32) -> (i32, i32, i32) {
    %c0_i32 = arith.constant 0 : i32
    %c0_i32_0 = arith.constant 0 : i32
    %c0_i32_1 = arith.constant 0 : i32
    return %arg0, %c0_i32, %c0_i32_0 : i32, i32, i32
  }
  func.func @transform_3(%arg0: i32, %arg1: i32) -> (i32, i32, i32) {
    %c0_i32 = arith.constant 0 : i32
    %c0_i32_0 = arith.constant 0 : i32
    %c0_i32_1 = arith.constant 0 : i32
    return %arg0, %c0_i32, %c0_i32_0 : i32, i32, i32
  }
  func.func @transform_4(%arg0: i32, %arg1: i32) -> (i32, i32) {
    %c0_i32 = arith.constant 0 : i32
    %c0_i32_0 = arith.constant 0 : i32
    %c0_i32_1 = arith.constant 0 : i32
    return %c0_i32, %c0_i32_0 : i32, i32
  }
  func.func @transform_5(%arg0: i32, %arg1: i32) -> (i32, i32) {
    %c0_i32 = arith.constant 0 : i32
    %c0_i32_0 = arith.constant 0 : i32
    %c0_i32_1 = arith.constant 0 : i32
    return %c0_i32, %c0_i32_0 : i32, i32
  }
  func.func @transform_6(%arg0: i32, %arg1: i32) -> (i32, i32) {
    %c0_i32 = arith.constant 0 : i32
    %c0_i32_0 = arith.constant 0 : i32
    %c0_i32_1 = arith.constant 0 : i32
    return %c0_i32, %c0_i32_0 : i32, i32
  }
  func.func @transform_7(%arg0: i32, %arg1: i32) -> (i32, i32) {
    %c0_i32 = arith.constant 0 : i32
    %c0_i32_0 = arith.constant 0 : i32
    %c0_i32_1 = arith.constant 0 : i32
    return %c0_i32, %c0_i32_0 : i32, i32
  }
  func.func @transform_8(%arg0: i32, %arg1: i32) -> (i32, i32) {
    %c0_i32 = arith.constant 0 : i32
    %c0_i32_0 = arith.constant 0 : i32
    %c0_i32_1 = arith.constant 0 : i32
    return %c0_i32, %c0_i32_0 : i32, i32
  }
  func.func @transform_9(%arg0: i32, %arg1: i32) -> (i32, i32) {
    %c0_i32 = arith.constant 0 : i32
    %c0_i32_0 = arith.constant 0 : i32
    %c0_i32_1 = arith.constant 0 : i32
    return %c0_i32, %c0_i32_0 : i32, i32
  }
  func.func @transform_10(%arg0: i32, %arg1: i32) -> (i32, i32) {
    %c0_i32 = arith.constant 0 : i32
    %c0_i32_0 = arith.constant 0 : i32
    %c0_i32_1 = arith.constant 0 : i32
    return %c0_i32, %c0_i32_0 : i32, i32
  }
  func.func @transform_11(%arg0: i32, %arg1: i32) -> (i32, i32, i32) {
    %c0_i32 = arith.constant 0 : i32
    %c0_i32_0 = arith.constant 0 : i32
    %c0_i32_1 = arith.constant 0 : i32
    return %arg0, %c0_i32, %c0_i32_0 : i32, i32, i32
  }
  func.func @transform_12(%arg0: i32, %arg1: i32) -> (i32, i32, i32) {
    %c0_i32 = arith.constant 0 : i32
    %c0_i32_0 = arith.constant 0 : i32
    %c0_i32_1 = arith.constant 0 : i32
    return %arg0, %c0_i32, %c0_i32_0 : i32, i32, i32
  }
  func.func @transform_13(%arg0: i32, %arg1: i32) -> (i32, i32, i32) {
    %c0_i32 = arith.constant 0 : i32
    %c0_i32_0 = arith.constant 0 : i32
    %c0_i32_1 = arith.constant 0 : i32
    return %arg0, %c0_i32, %c0_i32_0 : i32, i32, i32
  }
  func.func @transform_14(%arg0: i32, %arg1: i32) -> (i32, i32, i32) {
    %c0_i32 = arith.constant 0 : i32
    %c0_i32_0 = arith.constant 0 : i32
    %c0_i32_1 = arith.constant 0 : i32
    return %arg0, %c0_i32, %c0_i32_0 : i32, i32, i32
  }
}

</mosaic_0001>

<bundles_post_ra>
// kernel: tpu_custom_call.1
= control target key start
LH: loop header
LB: loop body
LE: loop exit
PB: predicated region body
PF: predicated region fallthrough
CT: control target
= control target key end

     0   :  { %s5534_s0 = inlined_call_operand.vmem [shape: s32[2,512,1], index: 0, kind: input, shape index: {}]   ;;  %s5535_s1 = inlined_call_operand.vmem [shape: f32[2,8,512], index: 1, kind: input, shape index: {}]   ;;  %s5536_s2 = inlined_call_operand.vmem [shape: f32[2,1,4], index: 2, kind: input, shape index: {}]   ;;  %s5537_s3 = inlined_call_operand.vmem [shape: f32[2,1,32], index: 3, kind: input, shape index: {}]   ;;  %s5538_s4 = inlined_call_operand.vmem [shape: f32[3,512], index: 4, kind: input, shape index: {}]   ;;  %s5539_s5 = inlined_call_operand.vmem [shape: f32[32,512], index: 5, kind: input, shape index: {}]   ;;  %s5540_s6 = inlined_call_operand.vmem [shape: f32[32,7], index: 6, kind: input, shape index: {}]   ;;  %s5541_s7 = inlined_call_operand.vmem [shape: f32[32,4], index: 7, kind: input, shape index: {}]   ;;  %s5542_s8 = inlined_call_operand.vmem [shape: f32[32,32], index: 8, kind: input, shape index: {}]   ;;  %s5543_s9 = inlined_call_operand.vmem [shape: f32[2,32], index: 9, kind: input, shape index: {}]   ;;  %s5544_s10 = inlined_call_operand.vmem [shape: f32[56,32], index: 10, kind: input, shape index: {}]   ;;  %s5545_s11 = inlined_call_operand.vmem [shape: f32[2,10,512], index: 11, kind: output, shape index: {0}]   ;;  %s5546_s12 = inlined_call_operand.hbm [shape: f32[2,2,512], index: 12, kind: output, shape index: {1}]   ;;  %s5547_s13 = inlined_call_operand.hbm [shape: f32[2,32,512], index: 13, kind: output, shape index: {2}]   ;;  %s5548_s14 = inlined_call_operand.hbm [shape: f32[2,88,128], index: 14, kind: output, shape index: {3}]  }
   0x1   :  { %5570 = sst [smem:[#allocation27_spill]] %s5534_s0 }
   0x2   :  { %5571 = sst [smem:[#allocation28_spill]] %s5535_s1 }
   0x3   :  { %5572 = sst [smem:[#allocation29_spill]] %s5536_s2 }
   0x4   :  { %5573 = sst [smem:[#allocation30_spill]] %s5537_s3 }
   0x5   :  { %5574 = sst [smem:[#allocation31_spill]] %s5538_s4 }
   0x6   :  { %5575 = sst [smem:[#allocation32_spill]] %s5539_s5 }
   0x7   :  { %5576 = sst [smem:[#allocation33_spill]] %s5540_s6 }
   0x8   :  { %5577 = sst [smem:[#allocation34_spill]] %s5541_s7 }
   0x9   :  { %5578 = sst [smem:[#allocation35_spill]] %s5545_s11 }
   0xa   :  { %20 = vsyncpa [#allocation4], 0 }
   0xb   :  { %22 = vsyncpa [#allocation4 + $0x1], 0 }
   0xc   :  { %23 = vsyncpa [#allocation6], 0 }
   0xd   :  { %25 = vsyncpa [#allocation6 + $0x1], 0  ;;  %s3943_s29 = smov 0   ;;  %s3945_s30 = smov 0  }
   0xe   :  { %s3947_s15 = smov 0   ;;  %s3949_s16 = smov 0  }
   0xf   :  { %s3951_s17 = smov 0   ;;  %s3953_s18 = smov 0  }
  0x10 LB: > { %5579 = sst [smem:[#allocation10_spill]] %s3843_s15  ;;  %s5550_s19 = sadd.s32 4294967295, %s3855_s18   ;;  %s3855_s18 = sphi %s3953_s18, %s31_s18   ;;  %s3851_s17 = sphi %s3951_s17, %s5805_s17   ;;  %s3847_s16 = sphi %s3949_s16, %s5804_s16   ;;  %s3843_s15 = sphi %s3947_s15, %s5803_s15   ;;  %s3839_s30 = sphi %s3945_s30, %s5807_s30   ;;  %s3835_s29 = sphi %s3943_s29, %s5806_s29  }
  0x11   : > { %5580 = sst [smem:[#allocation11_spill]] %s3851_s17  ;;  %s5549_s20 = sadd.s32 4294967294, %s3855_s18  }
  0x12   : > { %s43_s21 = sadd.s32 1, %s3851_s17  ;;  %s331_s22 = sadd.s32 1, %s3843_s15 }
  0x13   : > { %p45_p0 = scmp.ge.s32.totalorder %s43_s21, 2  ;;  %p341_p1 = scmp.ne.s32.totalorder %s3843_s15, %s3839_s30 }
  0x14   : > { %p342_p2 = scmp.eq.s32.totalorder %s5550_s19, 1  ;;  %p347_p3 = scmp.ne.s32.totalorder %s3839_s30, %s3835_s29 }
  0x15   : > { %s5809_s21 = smov (%p45_p0, %s43_s21), 0  ;;  %p348_p5 = scmp.eq.s32.totalorder %s5549_s20, 1 }
  0x16   : > { %5581 = sst [smem:[#allocation12_spill]] %s5809_s21  ;;  %p3985_p4 = por %p342_p2, %p341_p1 }
  0x17   : > { %s328_s24 = ssub.s32 %s3851_s17, %s5809_s21  ;;  %p3071_p6 = scmp.ge.s32.totalorder %s3855_s18, 1 }
  0x18   : > { %p329_p7 = scmp.eq.s32.totalorder %s328_s24, 0  ;;  %p3994_p8 = por %p348_p5, %p347_p3 }
  0x19   : > { %p477_p9 = scmp.lt.s32.totalorder %s3855_s18, 3 }
  0x1a   : > { %s4000_s26 = scalar_select %p329_p7, %s3843_s15, %s331_s22  }
  0x1b   : > { %p478_p10 = pnand %p3071_p6, %p477_p9 }
  0x1c   : > { %5584 = sst [smem:[#allocation13_spill]] %s4000_s26 }
  0x1d   : > { %481 = sbr.rel (%p478_p10) target bundleno = 1187 (0x4a3), region = 64 }
  0x22   : > { %p558_p11 = scmp.lt.s32.totalorder %s3847_s16, 1  ;;  %v3857_v0 = vmov 0   ;;  %s5585_s0 = sld [smem:[#allocation27_spill]]  ;;  %v5551_v61 = vlaneseq }
  0x23   : > { %3712 = vset.pattern.permute.xlu1 %v3857_v0  ;;  %3711 = vset.pattern.permute.xlu0 %v3857_v0  ;;  %s5586_s1 = sld [smem:[#allocation28_spill]]  ;;  %s5798_s22 = sadd.s32 4294967295, %s3855_s18  }
  0x24   : > { %s4004_s27 = scalar_select %p558_p11, %s3847_s16, 1  ;;  %v4075_v0 = vand.u32 127, %v5551_v61 }
  0x25   : > { %s5790_s4 = sld [smem:[#allocation31_spill]] }
  0x26   : > { %s3631_s28 = sshll.u32 %s4004_s27, 9  ;;  %s3632_s20 = sshll.u32 %s4004_s27, 5 }
  0x27   : > { %s5791_s11 = sld [smem:[#allocation35_spill]] }
  0x28   : > { %s4010_s19 = scalar_lea.vmem %s5585_s0, %s3631_s28  ;;  %s5792_s3 = sld [smem:[#allocation30_spill]] }
  0x29   : > { %v642_v1 = vld [vmem:[%s4010_s19 + $0x170] sm:$0xff]  ;;  %v643_v3 = vld [vmem:[%s4010_s19 + $0x178] sm:$0xff]  ;;  %v609_v5 = vld [vmem:[%s4010_s19 + $0x68] sm:$0xff]  ;;  %s4083_s24 = scalar_lea.vmem %s5586_s1, %s3632_s20  ;;  %s5793_s2 = sld [smem:[#allocation29_spill]] }
  0x2a   : > { %v610_v2 = vld [vmem:[%s4010_s19 + $0x70] sm:$0xff]  ;;  %808 = vperm.xlu1 %3712, %v642_v1   ;;  %v611_v4 = vld [vmem:[%s4010_s19 + $0x78] sm:$0xff]  ;;  %v608_v6 = vld [vmem:[%s4010_s19 + $0x60] sm:$0xff]  ;;  %s5794_s7 = sld [smem:[#allocation34_spill]]  ;;  %s3635_s1 = sshll.u32 %s3847_s16, 11 }
  0x2b   : > { %712 = vperm.xlu0 %3711, %v610_v2   ;;  %v641_v7 = vld [vmem:[%s4010_s19 + $0x168] sm:$0xff]  ;;  %v640_v8 = vld [vmem:[%s4010_s19 + $0x160] sm:$0xff]  ;;  %v607_v9 = vld [vmem:[%s4010_s19 + $0x58] sm:$0xff]  ;;  %s5796_s6 = sld [smem:[#allocation33_spill]]  ;;  %s5426_s15 = scalar_lea.hbm %s5547_s13, %s3635_s1 }
  0x2c   : > { %v606_v10 = vld [vmem:[%s4010_s19 + $0x50] sm:$0xff]  ;;  %v639_v11 = vld [vmem:[%s4010_s19 + $0x158] sm:$0xff]  ;;  %v605_v13 = vld [vmem:[%s4010_s19 + $0x48] sm:$0xff]  ;;  %s5797_s5 = sld [smem:[#allocation32_spill]] }
  0x2d   : > { %v638_v12 = vld [vmem:[%s4010_s19 + $0x150] sm:$0xff]  ;;  %v604_v14 = vld [vmem:[%s4010_s19 + $0x40] sm:$0xff]  ;;  %v637_v15 = vld [vmem:[%s4010_s19 + $0x148] sm:$0xff] }
  0x2e   : > { %811 = vperm.xlu1 %3712, %v643_v3   ;;  %v636_v16 = vld [vmem:[%s4010_s19 + $0x140] sm:$0xff]  ;;  %v603_v17 = vld [vmem:[%s4010_s19 + $0x38] sm:$0xff]  ;;  %v602_v18 = vld [vmem:[%s4010_s19 + $0x30] sm:$0xff]  ;;  %s582_s0 = scalar_lea.vmem %s5792_s3, %s4004_s27 }
  0x2f   : > { %715 = vperm.xlu0 %3711, %v611_v4   ;;  %v635_v19 = vld [vmem:[%s4010_s19 + $0x138] sm:$0xff]  ;;  %v634_v20 = vld [vmem:[%s4010_s19 + $0x130] sm:$0xff]  ;;  %v601_v21 = vld [vmem:[%s4010_s19 + $0x28] sm:$0xff] }
  0x30   : > { %v600_v22 = vld [vmem:[%s4010_s19 + $0x20] sm:$0xff]  ;;  %v633_v23 = vld [vmem:[%s4010_s19 + $0x128] sm:$0xff]  ;;  %v599_v25 = vld [vmem:[%s4010_s19 + $0x18] sm:$0xff] }
  0x31   : > { %v632_v24 = vld [vmem:[%s4010_s19 + $0x120] sm:$0xff]  ;;  %v598_v26 = vld [vmem:[%s4010_s19 + $0x10] sm:$0xff]  ;;  %v631_v27 = vld [vmem:[%s4010_s19 + $0x118] sm:$0xff] }
  0x32   : > { %709 = vperm.xlu1 %3712, %v609_v5   ;;  %v630_v28 = vld [vmem:[%s4010_s19 + $0x110] sm:$0xff]  ;;  %v597_v29 = vld [vmem:[%s4010_s19 + $0x8] sm:$0xff]  ;;  %v596_v30 = vld [vmem:[%s4010_s19] sm:$0xff] }
  0x33   : > { %706 = vperm.xlu0 %3711, %v608_v6   ;;  %v629_v31 = vld [vmem:[%s4010_s19 + $0x108] sm:$0xff]  ;;  %v628_v32 = vld [vmem:[%s4010_s19 + $0x100] sm:$0xff]  ;;  %v627_v33 = vld [vmem:[%s4010_s19 + $0xf8] sm:$0xff] }
  0x34   : > { %v626_v34 = vld [vmem:[%s4010_s19 + $0xf0] sm:$0xff]  ;;  %v659_v35 = vld [vmem:[%s4010_s19 + $0x1f8] sm:$0xff]  ;;  %v625_v37 = vld [vmem:[%s4010_s19 + $0xe8] sm:$0xff] }
  0x35   : > { %v658_v36 = vld [vmem:[%s4010_s19 + $0x1f0] sm:$0xff]  ;;  %v624_v38 = vld [vmem:[%s4010_s19 + $0xe0] sm:$0xff]  ;;  %v657_v39 = vld [vmem:[%s4010_s19 + $0x1e8] sm:$0xff] }
  0x36   : > { %805 = vperm.xlu1 %3712, %v641_v7   ;;  %v656_v40 = vld [vmem:[%s4010_s19 + $0x1e0] sm:$0xff]  ;;  %v623_v41 = vld [vmem:[%s4010_s19 + $0xd8] sm:$0xff]  ;;  %v622_v42 = vld [vmem:[%s4010_s19 + $0xd0] sm:$0xff]  ;;  %v4091_v7 = vadd.s32 128, %v4075_v0 }
  0x37   : > { %802 = vperm.xlu0 %3711, %v640_v8   ;;  %v655_v43 = vld [vmem:[%s4010_s19 + $0x1d8] sm:$0xff]  ;;  %v654_v44 = vld [vmem:[%s4010_s19 + $0x1d0] sm:$0xff]  ;;  %v621_v45 = vld [vmem:[%s4010_s19 + $0xc8] sm:$0xff] }
  0x38   : > { %v620_v46 = vld [vmem:[%s4010_s19 + $0xc0] sm:$0xff]  ;;  %v653_v47 = vld [vmem:[%s4010_s19 + $0x1c8] sm:$0xff]  ;;  %v619_v49 = vld [vmem:[%s4010_s19 + $0xb8] sm:$0xff] }
  0x39   : > { %v652_v48 = vld [vmem:[%s4010_s19 + $0x1c0] sm:$0xff]  ;;  %v618_v50 = vld [vmem:[%s4010_s19 + $0xb0] sm:$0xff]  ;;  %v651_v51 = vld [vmem:[%s4010_s19 + $0x1b8] sm:$0xff] }
  0x3a   : > { %703 = vperm.xlu1 %3712, %v607_v9   ;;  %v650_v52 = vld [vmem:[%s4010_s19 + $0x1b0] sm:$0xff]  ;;  %v617_v53 = vld [vmem:[%s4010_s19 + $0xa8] sm:$0xff]  ;;  %v616_v54 = vld [vmem:[%s4010_s19 + $0xa0] sm:$0xff] }
  0x3b   : > { %700 = vperm.xlu0 %3711, %v606_v10   ;;  %v649_v55 = vld [vmem:[%s4010_s19 + $0x1a8] sm:$0xff]  ;;  %v648_v56 = vld [vmem:[%s4010_s19 + $0x1a0] sm:$0xff]  ;;  %v615_v57 = vld [vmem:[%s4010_s19 + $0x98] sm:$0xff] }
  0x3c   : > { %v614_v58 = vld [vmem:[%s4010_s19 + $0x90] sm:$0xff]  ;;  %v647_v59 = vld [vmem:[%s4010_s19 + $0x198] sm:$0xff]  ;;  %v613_v62 = vld [vmem:[%s4010_s19 + $0x88] sm:$0xff] }
  0x3d   : > { %v646_v60 = vld [vmem:[%s4010_s19 + $0x190] sm:$0xff]  ;;  %v612_v63 = vld [vmem:[%s4010_s19 + $0x80] sm:$0xff]  ;;  %v645_v1 = vld [vmem:[%s4010_s19 + $0x188] sm:$0xff] }
  0x3e   : > { %799 = vperm.xlu1 %3712, %v639_v11   ;;  %v644_v2 = vld [vmem:[%s4010_s19 + $0x180] sm:$0xff]  ;;  %v661_v3 = vld [vmem:[%s4083_s24 + $0x8] sm:$0xff]  ;;  %v663_v8 = vld [vmem:[%s4083_s24 + $0x18] sm:$0xff]  ;;  %s3633_s19 = sshll.u32 %s4004_s27, 6 }
  0x3f   : > { %796 = vperm.xlu0 %3711, %v638_v12   ;;  %v4088_v6 = vpack.c.bf16 %v661_v3, %v661_v3  ;;  %v4095_v9 = vpack.c.bf16 %v663_v8, %v663_v8  ;;  %v5559_v12 = vmov 1.0|1.0   ;;  %v5637_v8 = vmov 0  ;;  %s5110_s21 = scalar_lea.vmem %s5791_s11, %s3633_s19 }
  0x41   : > { %1797 = vmatprep.mubr.bf16.mxu0 %v4088_v6  ;;  %1838 = vmatprep.mubr.bf16.mxu1 %v4095_v9 }
  0x42   : > { %697 = vperm.xlu1 %3712, %v605_v13   ;;  %v4112_v13 = vadd.s32 384, %v4075_v0 }
  0x43   : > { %694 = vperm.xlu0 %3711, %v604_v14   ;;  %v4115_v14 = vadd.s32 256, %v4075_v0 }
  0x46   : > { %793 = vperm.xlu1 %3712, %v637_v15  }
  0x47   : > { %790 = vperm.xlu0 %3711, %v636_v16  }
  0x4a   : > { %691 = vperm.xlu1 %3712, %v603_v17  }
  0x4b   : > { %688 = vperm.xlu0 %3711, %v602_v18  }
  0x4e   : > { %787 = vperm.xlu1 %3712, %v635_v19  }
  0x4f   : > { %784 = vperm.xlu0 %3711, %v634_v20  }
  0x52   : > { %685 = vperm.xlu1 %3712, %v601_v21  }
  0x53   : > { %682 = vperm.xlu0 %3711, %v600_v22  }
  0x56   : > { %781 = vperm.xlu1 %3712, %v633_v23   ;;  %v5591_v23 = vmov 0 }
  0x57   : > { %778 = vperm.xlu0 %3711, %v632_v24   ;;  %v5593_v24 = vmov 0 }
  0x5a   : > { %679 = vperm.xlu1 %3712, %v599_v25  }
  0x5b   : > { %676 = vperm.xlu0 %3711, %v598_v26  }
  0x5e   : > { %775 = vperm.xlu1 %3712, %v631_v27   ;;  %v5595_v27 = vmov 0 }
  0x5f   : > { %772 = vperm.xlu0 %3711, %v630_v28   ;;  %v5597_v28 = vmov 0 }
  0x62   : > { %673 = vperm.xlu1 %3712, %v597_v29  }
  0x63   : > { %670 = vperm.xlu0 %3711, %v596_v30  }
  0x66   : > { %769 = vperm.xlu1 %3712, %v629_v31   ;;  %v5599_v31 = vmov 0 }
  0x67   : > { %766 = vperm.xlu0 %3711, %v628_v32   ;;  %v5601_v32 = vmov 0 }
  0x6a   : > { %763 = vperm.xlu1 %3712, %v627_v33  }
  0x6b   : > { %760 = vperm.xlu0 %3711, %v626_v34  }
  0x6e   : > { %859 = vperm.xlu1 %3712, %v659_v35   ;;  %v5603_v35 = vmov 0 }
  0x6f   : > { %856 = vperm.xlu0 %3711, %v658_v36   ;;  %v5605_v36 = vmov 0 }
  0x72   : > { %757 = vperm.xlu1 %3712, %v625_v37  }
  0x73   : > { %754 = vperm.xlu0 %3711, %v624_v38  }
  0x76   : > { %853 = vperm.xlu1 %3712, %v657_v39   ;;  %v5607_v39 = vmov 0 }
  0x77   : > { %850 = vperm.xlu0 %3711, %v656_v40   ;;  %v5609_v40 = vmov 0 }
  0x7a   : > { %751 = vperm.xlu1 %3712, %v623_v41  }
  0x7b   : > { %748 = vperm.xlu0 %3711, %v622_v42  }
  0x7e   : > { %847 = vperm.xlu1 %3712, %v655_v43   ;;  %v5611_v43 = vmov 0 }
  0x7f   : > { %844 = vperm.xlu0 %3711, %v654_v44   ;;  %v5613_v44 = vmov 0 }
  0x82   : > { %745 = vperm.xlu1 %3712, %v621_v45  }
  0x83   : > { %742 = vperm.xlu0 %3711, %v620_v46  }
  0x86   : > { %841 = vperm.xlu1 %3712, %v653_v47   ;;  %v5615_v47 = vmov 0 }
  0x87   : > { %838 = vperm.xlu0 %3711, %v652_v48   ;;  %v5617_v48 = vmov 0 }
  0x8a   : > { %739 = vperm.xlu1 %3712, %v619_v49  }
  0x8b   : > { %736 = vperm.xlu0 %3711, %v618_v50  }
  0x8e   : > { %835 = vperm.xlu1 %3712, %v651_v51   ;;  %v5619_v51 = vmov 0 }
  0x8f   : > { %832 = vperm.xlu0 %3711, %v650_v52   ;;  %v5621_v52 = vmov 0 }
  0x92   : > { %733 = vperm.xlu1 %3712, %v617_v53  }
  0x93   : > { %730 = vperm.xlu0 %3711, %v616_v54  }
  0x96   : > { %829 = vperm.xlu1 %3712, %v649_v55   ;;  %v5623_v55 = vmov 0 }
  0x97   : > { %826 = vperm.xlu0 %3711, %v648_v56   ;;  %v5625_v56 = vmov 0 }
  0x9a   : > { %727 = vperm.xlu1 %3712, %v615_v57  }
  0x9b   : > { %724 = vperm.xlu0 %3711, %v614_v58  }
  0x9e   : > { %823 = vperm.xlu1 %3712, %v647_v59   ;;  %v5627_v59 = vmov 0 }
  0x9f   : > { %820 = vperm.xlu0 %3711, %v646_v60   ;;  %v5629_v60 = vmov 0 }
  0xa2   : > { %721 = vperm.xlu1 %3712, %v613_v62  }
  0xa3   : > { %718 = vperm.xlu0 %3711, %v612_v63  }
  0xa5   : > { %v4086_v4 = vpop.permute.xlu1 %808 }
  0xa6   : > { %v713_v5 = vpop.permute.xlu0 %712  ;;  %817 = vperm.xlu1 %3712, %v645_v1   ;;  %vm1046_vm4 = vcmp.eq.s32.totalorder %v4091_v7, %v4086_v4  ;;  %vm1045_vm10 = vcmp.eq.s32.totalorder %v4075_v0, %v4086_v4  ;;  %v5631_v1 = vmov 0 }
  0xa7   : > { %814 = vperm.xlu0 %3711, %v644_v2   ;;  %vm918_vm0 = vcmp.eq.s32.totalorder %v4091_v7, %v713_v5  ;;  %vm917_vm8 = vcmp.eq.s32.totalorder %v4075_v0, %v713_v5  ;;  %v5633_v2 = vmov 0 }
  0xa9   : > { %v4097_v10 = vpop.permute.xlu1 %811 }
  0xaa   : > { %v716_v11 = vpop.permute.xlu0 %715  ;;  %vm1050_vm2 = vcmp.eq.s32.totalorder %v4091_v7, %v4097_v10  ;;  %vm1049_vm6 = vcmp.eq.s32.totalorder %v4075_v0, %v4097_v10 }
  0xab   : > { %vm922_vm1 = vcmp.eq.s32.totalorder %v4091_v7, %v716_v11  ;;  %vm921_vm5 = vcmp.eq.s32.totalorder %v4075_v0, %v716_v11  ;;  %vm3400_vm7 = vmpackc.low %vm1050_vm2, %vm1046_vm4  ;;  %vm924_vm14 = vcmp.eq.s32.totalorder %v4112_v13, %v716_v11  ;;  %vm923_vm15 = vcmp.eq.s32.totalorder %v4115_v14, %v716_v11 }
  0xac   : > { %vm3336_vm3 = vmpackc.low %vm922_vm1, %vm918_vm0  ;;  %3401 = vmatprep.subr.msk.bf16.mxu1 %vm3400_vm7, %v5559_v12  ;;  %vm920_vm4 = vcmp.eq.s32.totalorder %v4112_v13, %v713_v5 }
  0xad   : > { %3337 = vmatprep.subr.msk.bf16.mxu0 %vm3336_vm3, %v5559_v12  ;;  %vm3338_vm9 = vmpackc.low %vm921_vm5, %vm917_vm8  ;;  %v710_v15 = vpop.permute.xlu1 %709  ;;  %vm919_vm5 = vcmp.eq.s32.totalorder %v4115_v14, %v713_v5  ;;  %v5635_v5 = vmov 0 }
  0xae   : > { %v707_v16 = vpop.permute.xlu0 %706  ;;  %3339 = vmatpush1.bf16.msk.msra.mxu0 %vm3338_vm9, %v5559_v12  ;;  %vm3402_vm11 = vmpackc.low %vm1049_vm6, %vm1045_vm10  ;;  %vm914_vm13 = vcmp.eq.s32.totalorder %v4091_v7, %v710_v15  ;;  %vm913_vm2 = vcmp.eq.s32.totalorder %v4075_v0, %v710_v15 }
  0xaf   : > { %vm910_vm12 = vcmp.eq.s32.totalorder %v4091_v7, %v707_v16  ;;  %3403 = vmatpush1.bf16.msk.msra.mxu1 %vm3402_vm11, %v5559_v12  ;;  %vm909_vm1 = vcmp.eq.s32.totalorder %v4075_v0, %v707_v16  ;;  %vm4135_vm6 = vmpackc.low %vm924_vm14, %vm920_vm4  ;;  %vm912_vm10 = vcmp.eq.s32.totalorder %v4112_v13, %v707_v16  ;;  %vm916_vm11 = vcmp.eq.s32.totalorder %v4112_v13, %v710_v15 }
  0xb0   : > { %vm3340_vm0 = vmpackc.low %vm914_vm13, %vm910_vm12  ;;  %vm911_vm4 = vcmp.eq.s32.totalorder %v4115_v14, %v707_v16  ;;  %v5641_v16 = vmov 0 }
  0xb1   : > { %3341 = vmatprep.subr.msk.bf16.mxu0 %vm3340_vm0, %v5559_v12  ;;  %vm3342_vm3 = vmpackc.low %vm913_vm2, %vm909_vm1  ;;  %v4131_v17 = vpop.permute.xlu1 %805  ;;  %vm1052_vm0 = vcmp.eq.s32.totalorder %v4112_v13, %v4097_v10  ;;  %vm1048_vm2 = vcmp.eq.s32.totalorder %v4112_v13, %v4086_v4 }
  0xb2   : > { %v4133_v18 = vpop.permute.xlu0 %802  ;;  %3343 = vmatpush1.bf16.msk.msra.mxu0 %vm3342_vm3, %v5559_v12  ;;  %vm1042_vm8 = vcmp.eq.s32.totalorder %v4091_v7, %v4131_v17  ;;  %vm4146_vm9 = vmpackc.low %vm923_vm15, %vm919_vm5  ;;  %vm1041_vm14 = vcmp.eq.s32.totalorder %v4075_v0, %v4131_v17  ;;  %vm915_vm3 = vcmp.eq.s32.totalorder %v4115_v14, %v710_v15  ;;  %v5639_v15 = vmov 0 }
  0xb3   : > { %vm1038_vm7 = vcmp.eq.s32.totalorder %v4091_v7, %v4133_v18  ;;  %vm1037_vm13 = vcmp.eq.s32.totalorder %v4075_v0, %v4133_v18  ;;  %vm4160_vm1 = vmpackc.low %vm916_vm11, %vm912_vm10  ;;  %vm1051_vm10 = vcmp.eq.s32.totalorder %v4115_v14, %v4097_v10 }
  0xb4   : > { %vm3404_vm12 = vmpackc.low %vm1042_vm8, %vm1038_vm7  ;;  %v5592_v23 = vsel %vm4160_vm1, 4294967295, %v5591_v23 }
  0xb5   : > { %3405 = vmatprep.subr.msk.bf16.mxu1 %vm3404_vm12, %v5559_v12  ;;  %vm3406_vm15 = vmpackc.low %vm1041_vm14, %vm1037_vm13  ;;  %v704_v21 = vpop.permute.xlu1 %703 }
  0xb6   : > { %3407 = vmatpush1.bf16.msk.msra.mxu1 %vm3406_vm15, %v5559_v12  ;;  %v701_v22 = vpop.permute.xlu0 %700  ;;  %vm906_vm7 = vcmp.eq.s32.totalorder %v4091_v7, %v704_v21  ;;  %vm4170_vm8 = vmpackc.low %vm1052_vm0, %vm1048_vm2  ;;  %vm905_vm13 = vcmp.eq.s32.totalorder %v4075_v0, %v704_v21  ;;  %vm1047_vm15 = vcmp.eq.s32.totalorder %v4115_v14, %v4086_v4 }
  0xb7   : > { %vm902_vm5 = vcmp.eq.s32.totalorder %v4091_v7, %v701_v22  ;;  %v5594_v24 = vsel %vm4170_vm8, 4294967295, %v5593_v24  ;;  %vm901_vm12 = vcmp.eq.s32.totalorder %v4075_v0, %v701_v22  ;;  %vm4188_vm0 = vmpackc.low %vm915_vm3, %vm911_vm4 }
  0xb8   : > { %vm3344_vm11 = vmpackc.low %vm906_vm7, %vm902_vm5  ;;  %v5596_v27 = vsel %vm4188_vm0, 4294967295, %v5595_v27 }
  0xb9   : > { %3345 = vmatprep.subr.msk.bf16.mxu0 %vm3344_vm11, %v5559_v12  ;;  %vm3346_vm14 = vmpackc.low %vm905_vm13, %vm901_vm12  ;;  %v4181_v25 = vpop.permute.xlu1 %799  ;;  %vm904_vm11 = vcmp.eq.s32.totalorder %v4112_v13, %v701_v22  ;;  %vm908_vm12 = vcmp.eq.s32.totalorder %v4112_v13, %v704_v21 }
  0xba   : > { %3347 = vmatpush1.bf16.msk.msra.mxu0 %vm3346_vm14, %v5559_v12  ;;  %v4184_v26 = vpop.permute.xlu0 %796  ;;  %vm1034_vm5 = vcmp.eq.s32.totalorder %v4091_v7, %v4181_v25  ;;  %vm4196_vm7 = vmpackc.low %vm1051_vm10, %vm1047_vm15  ;;  %vm1033_vm4 = vcmp.eq.s32.totalorder %v4075_v0, %v4181_v25  ;;  %vm1040_vm14 = vcmp.eq.s32.totalorder %v4112_v13, %v4133_v18  ;;  %vm1044_vm10 = vcmp.eq.s32.totalorder %v4112_v13, %v4131_v17 }
  0xbb   : > { %vm1030_vm2 = vcmp.eq.s32.totalorder %v4091_v7, %v4184_v26  ;;  %v5598_v28 = vsel %vm4196_vm7, 4294967295, %v5597_v28  ;;  %vm1029_vm3 = vcmp.eq.s32.totalorder %v4075_v0, %v4184_v26  ;;  %vm903_vm7 = vcmp.eq.s32.totalorder %v4115_v14, %v701_v22  ;;  %vm4220_vm1 = vmpackc.low %vm1044_vm10, %vm1040_vm14 }
  0xbc   : > { %vm3408_vm13 = vmpackc.low %vm1034_vm5, %vm1030_vm2  ;;  %vm907_vm5 = vcmp.eq.s32.totalorder %v4115_v14, %v704_v21  ;;  %v5602_v32 = vsel %vm4220_vm1, 4294967295, %v5601_v32  ;;  %v5643_v21 = vmov 0  ;;  %v5645_v22 = vmov 0 }
  0xbd   : > { %3409 = vmatprep.subr.msk.bf16.mxu1 %vm3408_vm13, %v5559_v12  ;;  %vm3410_vm15 = vmpackc.low %vm1033_vm4, %vm1029_vm3  ;;  %v698_v29 = vpop.permute.xlu1 %697  ;;  %vm1043_vm13 = vcmp.eq.s32.totalorder %v4115_v14, %v4131_v17 }
  0xbe   : > { %3411 = vmatpush1.bf16.msk.msra.mxu1 %vm3410_vm15, %v5559_v12  ;;  %v695_v30 = vpop.permute.xlu0 %694  ;;  %vm4212_vm2 = vmpackc.low %vm908_vm12, %vm904_vm11  ;;  %vm898_vm8 = vcmp.eq.s32.totalorder %v4091_v7, %v698_v29  ;;  %vm1039_vm11 = vcmp.eq.s32.totalorder %v4115_v14, %v4133_v18  ;;  %vm897_vm4 = vcmp.eq.s32.totalorder %v4075_v0, %v698_v29 }
  0xbf   : > { %v5600_v31 = vsel %vm4212_vm2, 4294967295, %v5599_v31  ;;  %vm894_vm0 = vcmp.eq.s32.totalorder %v4091_v7, %v695_v30  ;;  %vm893_vm3 = vcmp.eq.s32.totalorder %v4075_v0, %v695_v30  ;;  %vm4238_vm14 = vmpackc.low %vm907_vm5, %vm903_vm7 }
  0xc0   : > { %vm3348_vm12 = vmpackc.low %vm898_vm8, %vm894_vm0  ;;  %v5604_v35 = vsel %vm4238_vm14, 4294967295, %v5603_v35 }
  0xc1   : > { %3349 = vmatprep.subr.msk.bf16.mxu0 %vm3348_vm12, %v5559_v12  ;;  %vm3350_vm15 = vmpackc.low %vm897_vm4, %vm893_vm3  ;;  %v4231_v33 = vpop.permute.xlu1 %793  ;;  %vm896_vm12 = vcmp.eq.s32.totalorder %v4112_v13, %v695_v30  ;;  %vm900_vm3 = vcmp.eq.s32.totalorder %v4112_v13, %v698_v29 }
  0xc2   : > { %3351 = vmatpush1.bf16.msk.msra.mxu0 %vm3350_vm15, %v5559_v12  ;;  %v4234_v34 = vpop.permute.xlu0 %790  ;;  %vm1026_vm0 = vcmp.eq.s32.totalorder %v4091_v7, %v4231_v33  ;;  %vm4246_vm10 = vmpackc.low %vm1043_vm13, %vm1039_vm11  ;;  %vm1025_vm5 = vcmp.eq.s32.totalorder %v4075_v0, %v4231_v33  ;;  %vm1032_vm15 = vcmp.eq.s32.totalorder %v4112_v13, %v4184_v26  ;;  %vm1036_vm13 = vcmp.eq.s32.totalorder %v4112_v13, %v4181_v25 }
  0xc3   : > { %vm1022_vm8 = vcmp.eq.s32.totalorder %v4091_v7, %v4234_v34  ;;  %v5606_v36 = vsel %vm4246_vm10, 4294967295, %v5605_v36  ;;  %vm1021_vm7 = vcmp.eq.s32.totalorder %v4075_v0, %v4234_v34  ;;  %vm895_vm10 = vcmp.eq.s32.totalorder %v4115_v14, %v695_v30  ;;  %vm4270_vm2 = vmpackc.low %vm1036_vm13, %vm1032_vm15 }
  0xc4   : > { %vm3412_vm4 = vmpackc.low %vm1026_vm0, %vm1022_vm8  ;;  %vm899_vm0 = vcmp.eq.s32.totalorder %v4115_v14, %v698_v29  ;;  %v5610_v40 = vsel %vm4270_vm2, 4294967295, %v5609_v40  ;;  %v5647_v29 = vmov 0  ;;  %v5649_v30 = vmov 0 }
  0xc5   : > { %3413 = vmatprep.subr.msk.bf16.mxu1 %vm3412_vm4, %v5559_v12  ;;  %vm3414_vm11 = vmpackc.low %vm1025_vm5, %vm1021_vm7  ;;  %v692_v37 = vpop.permute.xlu1 %691  ;;  %vm1035_vm4 = vcmp.eq.s32.totalorder %v4115_v14, %v4181_v25 }
  0xc6   : > { %3415 = vmatpush1.bf16.msk.msra.mxu1 %vm3414_vm11, %v5559_v12  ;;  %v689_v38 = vpop.permute.xlu0 %688  ;;  %vm4262_vm8 = vmpackc.low %vm900_vm3, %vm896_vm12  ;;  %vm890_vm1 = vcmp.eq.s32.totalorder %v4091_v7, %v692_v37  ;;  %vm1031_vm12 = vcmp.eq.s32.totalorder %v4115_v14, %v4184_v26  ;;  %vm889_vm5 = vcmp.eq.s32.totalorder %v4075_v0, %v692_v37 }
  0xc7   : > { %v5608_v39 = vsel %vm4262_vm8, 4294967295, %v5607_v39  ;;  %vm886_vm14 = vcmp.eq.s32.totalorder %v4091_v7, %v689_v38  ;;  %vm885_vm7 = vcmp.eq.s32.totalorder %v4075_v0, %v689_v38  ;;  %vm4288_vm15 = vmpackc.low %vm899_vm0, %vm895_vm10 }
  0xc8   : > { %vm3352_vm3 = vmpackc.low %vm890_vm1, %vm886_vm14  ;;  %v5612_v43 = vsel %vm4288_vm15, 4294967295, %v5611_v43 }
  0xc9   : > { %3353 = vmatprep.subr.msk.bf16.mxu0 %vm3352_vm3, %v5559_v12  ;;  %vm3354_vm11 = vmpackc.low %vm889_vm5, %vm885_vm7  ;;  %v4281_v41 = vpop.permute.xlu1 %787  ;;  %vm888_vm3 = vcmp.eq.s32.totalorder %v4112_v13, %v689_v38  ;;  %vm892_vm7 = vcmp.eq.s32.totalorder %v4112_v13, %v692_v37 }
  0xca   : > { %3355 = vmatpush1.bf16.msk.msra.mxu0 %vm3354_vm11, %v5559_v12  ;;  %v4284_v42 = vpop.permute.xlu0 %784  ;;  %vm1018_vm14 = vcmp.eq.s32.totalorder %v4091_v7, %v4281_v41  ;;  %vm4296_vm13 = vmpackc.low %vm1035_vm4, %vm1031_vm12  ;;  %vm1017_vm0 = vcmp.eq.s32.totalorder %v4075_v0, %v4281_v41  ;;  %vm1024_vm11 = vcmp.eq.s32.totalorder %v4112_v13, %v4234_v34  ;;  %vm1028_vm4 = vcmp.eq.s32.totalorder %v4112_v13, %v4231_v33 }
  0xcb   : > { %vm1014_vm1 = vcmp.eq.s32.totalorder %v4091_v7, %v4284_v42  ;;  %v5614_v44 = vsel %vm4296_vm13, 4294967295, %v5613_v44  ;;  %vm1013_vm10 = vcmp.eq.s32.totalorder %v4075_v0, %v4284_v42  ;;  %vm887_vm13 = vcmp.eq.s32.totalorder %v4115_v14, %v689_v38  ;;  %vm4320_vm8 = vmpackc.low %vm1028_vm4, %vm1024_vm11 }
  0xcc   : > { %vm3416_vm5 = vmpackc.low %vm1018_vm14, %vm1014_vm1  ;;  %vm891_vm14 = vcmp.eq.s32.totalorder %v4115_v14, %v692_v37  ;;  %v5618_v48 = vsel %vm4320_vm8, 4294967295, %v5617_v48  ;;  %v5651_v37 = vmov 0  ;;  %v5653_v38 = vmov 0 }
  0xcd   : > { %3417 = vmatprep.subr.msk.bf16.mxu1 %vm3416_vm5, %v5559_v12  ;;  %vm3418_vm12 = vmpackc.low %vm1017_vm0, %vm1013_vm10  ;;  %v686_v45 = vpop.permute.xlu1 %685  ;;  %vm1027_vm5 = vcmp.eq.s32.totalorder %v4115_v14, %v4231_v33 }
  0xce   : > { %3419 = vmatpush1.bf16.msk.msra.mxu1 %vm3418_vm12, %v5559_v12  ;;  %v683_v46 = vpop.permute.xlu0 %682  ;;  %vm4312_vm1 = vmpackc.low %vm892_vm7, %vm888_vm3  ;;  %vm882_vm2 = vcmp.eq.s32.totalorder %v4091_v7, %v686_v45  ;;  %vm1023_vm3 = vcmp.eq.s32.totalorder %v4115_v14, %v4234_v34  ;;  %vm881_vm0 = vcmp.eq.s32.totalorder %v4075_v0, %v686_v45 }
  0xcf   : > { %v5616_v47 = vsel %vm4312_vm1, 4294967295, %v5615_v47  ;;  %vm878_vm15 = vcmp.eq.s32.totalorder %v4091_v7, %v683_v46  ;;  %vm877_vm10 = vcmp.eq.s32.totalorder %v4075_v0, %v683_v46  ;;  %vm4338_vm11 = vmpackc.low %vm891_vm14, %vm887_vm13 }
  0xd0   : > { %vm3356_vm7 = vmpackc.low %vm882_vm2, %vm878_vm15  ;;  %v5620_v51 = vsel %vm4338_vm11, 4294967295, %v5619_v51 }
  0xd1   : > { %3357 = vmatprep.subr.msk.bf16.mxu0 %vm3356_vm7, %v5559_v12  ;;  %vm3358_vm12 = vmpackc.low %vm881_vm0, %vm877_vm10  ;;  %v4331_v49 = vpop.permute.xlu1 %781  ;;  %vm880_vm7 = vcmp.eq.s32.totalorder %v4112_v13, %v683_v46  ;;  %vm884_vm10 = vcmp.eq.s32.totalorder %v4112_v13, %v686_v45 }
  0xd2   : > { %3359 = vmatpush1.bf16.msk.msra.mxu0 %vm3358_vm12, %v5559_v12  ;;  %v4334_v50 = vpop.permute.xlu0 %778  ;;  %vm1010_vm15 = vcmp.eq.s32.totalorder %v4091_v7, %v4331_v49  ;;  %vm4346_vm4 = vmpackc.low %vm1027_vm5, %vm1023_vm3  ;;  %vm1009_vm14 = vcmp.eq.s32.totalorder %v4075_v0, %v4331_v49  ;;  %vm1016_vm12 = vcmp.eq.s32.totalorder %v4112_v13, %v4284_v42  ;;  %vm1020_vm5 = vcmp.eq.s32.totalorder %v4112_v13, %v4281_v41 }
  0xd3   : > { %vm1006_vm2 = vcmp.eq.s32.totalorder %v4091_v7, %v4334_v50  ;;  %v5622_v52 = vsel %vm4346_vm4, 4294967295, %v5621_v52  ;;  %vm1005_vm13 = vcmp.eq.s32.totalorder %v4075_v0, %v4334_v50  ;;  %vm879_vm4 = vcmp.eq.s32.totalorder %v4115_v14, %v683_v46  ;;  %vm4370_vm1 = vmpackc.low %vm1020_vm5, %vm1016_vm12 }
  0xd4   : > { %vm3420_vm0 = vmpackc.low %vm1010_vm15, %vm1006_vm2  ;;  %vm883_vm15 = vcmp.eq.s32.totalorder %v4115_v14, %v686_v45  ;;  %v5626_v56 = vsel %vm4370_vm1, 4294967295, %v5625_v56  ;;  %v5655_v45 = vmov 0  ;;  %v5657_v46 = vmov 0 }
  0xd5   : > { %3421 = vmatprep.subr.msk.bf16.mxu1 %vm3420_vm0, %v5559_v12  ;;  %vm3422_vm3 = vmpackc.low %vm1009_vm14, %vm1005_vm13  ;;  %v680_v53 = vpop.permute.xlu1 %679  ;;  %vm1019_vm0 = vcmp.eq.s32.totalorder %v4115_v14, %v4281_v41 }
  0xd6   : > { %3423 = vmatpush1.bf16.msk.msra.mxu1 %vm3422_vm3, %v5559_v12  ;;  %v677_v54 = vpop.permute.xlu0 %676  ;;  %vm4362_vm2 = vmpackc.low %vm884_vm10, %vm880_vm7  ;;  %vm874_vm8 = vcmp.eq.s32.totalorder %v4091_v7, %v680_v53  ;;  %vm1015_vm7 = vcmp.eq.s32.totalorder %v4115_v14, %v4284_v42  ;;  %vm873_vm14 = vcmp.eq.s32.totalorder %v4075_v0, %v680_v53 }
  0xd7   : > { %v5624_v55 = vsel %vm4362_vm2, 4294967295, %v5623_v55  ;;  %vm870_vm11 = vcmp.eq.s32.totalorder %v4091_v7, %v677_v54  ;;  %vm869_vm13 = vcmp.eq.s32.totalorder %v4075_v0, %v677_v54  ;;  %vm4388_vm12 = vmpackc.low %vm883_vm15, %vm879_vm4 }
  0xd8   : > { %vm3360_vm10 = vmpackc.low %vm874_vm8, %vm870_vm11  ;;  %v5628_v59 = vsel %vm4388_vm12, 4294967295, %v5627_v59 }
  0xd9   : > { %3361 = vmatprep.subr.msk.bf16.mxu0 %vm3360_vm10, %v5559_v12  ;;  %vm3362_vm3 = vmpackc.low %vm873_vm14, %vm869_vm13  ;;  %v4381_v57 = vpop.permute.xlu1 %775  ;;  %vm872_vm10 = vcmp.eq.s32.totalorder %v4112_v13, %v677_v54  ;;  %vm876_vm13 = vcmp.eq.s32.totalorder %v4112_v13, %v680_v53 }
  0xda   : > { %3363 = vmatpush1.bf16.msk.msra.mxu0 %vm3362_vm3, %v5559_v12  ;;  %v4384_v58 = vpop.permute.xlu0 %772  ;;  %vm1002_vm11 = vcmp.eq.s32.totalorder %v4091_v7, %v4381_v57  ;;  %vm4396_vm5 = vmpackc.low %vm1019_vm0, %vm1015_vm7  ;;  %vm1001_vm15 = vcmp.eq.s32.totalorder %v4075_v0, %v4381_v57  ;;  %vm1008_vm3 = vcmp.eq.s32.totalorder %v4112_v13, %v4334_v50  ;;  %vm1012_vm0 = vcmp.eq.s32.totalorder %v4112_v13, %v4331_v49 }
  0xdb   : > { %vm998_vm8 = vcmp.eq.s32.totalorder %v4091_v7, %v4384_v58  ;;  %v5630_v60 = vsel %vm4396_vm5, 4294967295, %v5629_v60  ;;  %vm997_vm4 = vcmp.eq.s32.totalorder %v4075_v0, %v4384_v58  ;;  %vm871_vm5 = vcmp.eq.s32.totalorder %v4115_v14, %v677_v54  ;;  %vm4420_vm2 = vmpackc.low %vm1012_vm0, %vm1008_vm3 }
  0xdc   : > { %vm3424_vm14 = vmpackc.low %vm1002_vm11, %vm998_vm8  ;;  %vm875_vm11 = vcmp.eq.s32.totalorder %v4115_v14, %v680_v53  ;;  %v5634_v2 = vsel %vm4420_vm2, 4294967295, %v5633_v2  ;;  %v5659_v53 = vmov 0  ;;  %v5661_v54 = vmov 0 }
  0xdd   : > { %3425 = vmatprep.subr.msk.bf16.mxu1 %vm3424_vm14, %v5559_v12  ;;  %vm3426_vm7 = vmpackc.low %vm1001_vm15, %vm997_vm4  ;;  %v674_v62 = vpop.permute.xlu1 %673  ;;  %vm1011_vm14 = vcmp.eq.s32.totalorder %v4115_v14, %v4331_v49 }
  0xde   : > { %3427 = vmatpush1.bf16.msk.msra.mxu1 %vm3426_vm7, %v5559_v12  ;;  %v671_v63 = vpop.permute.xlu0 %670  ;;  %vm4412_vm8 = vmpackc.low %vm876_vm13, %vm872_vm10  ;;  %vm866_vm1 = vcmp.eq.s32.totalorder %v4091_v7, %v674_v62  ;;  %vm1007_vm10 = vcmp.eq.s32.totalorder %v4115_v14, %v4334_v50  ;;  %vm865_vm15 = vcmp.eq.s32.totalorder %v4075_v0, %v674_v62 }
  0xdf   : > { %v5632_v1 = vsel %vm4412_vm8, 4294967295, %v5631_v1  ;;  %vm862_vm12 = vcmp.eq.s32.totalorder %v4091_v7, %v671_v63  ;;  %vm861_vm4 = vcmp.eq.s32.totalorder %v4075_v0, %v671_v63  ;;  %vm4438_vm3 = vmpackc.low %vm875_vm11, %vm871_vm5 }
  0xe0   : > { %vm3364_vm13 = vmpackc.low %vm866_vm1, %vm862_vm12  ;;  %v5636_v5 = vsel %vm4438_vm3, 4294967295, %v5635_v5 }
  0xe1   : > { %3365 = vmatprep.subr.msk.bf16.mxu0 %vm3364_vm13, %v5559_v12  ;;  %vm3366_vm7 = vmpackc.low %vm865_vm15, %vm861_vm4  ;;  %v4431_v3 = vpop.permute.xlu1 %769  ;;  %vm864_vm13 = vcmp.eq.s32.totalorder %v4112_v13, %v671_v63  ;;  %vm868_vm4 = vcmp.eq.s32.totalorder %v4112_v13, %v674_v62 }
  0xe2   : > { %3367 = vmatpush1.bf16.msk.msra.mxu0 %vm3366_vm7, %v5559_v12  ;;  %v4434_v4 = vpop.permute.xlu0 %766  ;;  %vm994_vm12 = vcmp.eq.s32.totalorder %v4091_v7, %v4431_v3  ;;  %vm4446_vm0 = vmpackc.low %vm1011_vm14, %vm1007_vm10  ;;  %vm993_vm11 = vcmp.eq.s32.totalorder %v4075_v0, %v4431_v3  ;;  %vm1000_vm7 = vcmp.eq.s32.totalorder %v4112_v13, %v4384_v58  ;;  %vm1004_vm14 = vcmp.eq.s32.totalorder %v4112_v13, %v4381_v57 }
  0xe3   : > { %vm990_vm1 = vcmp.eq.s32.totalorder %v4091_v7, %v4434_v4  ;;  %v5638_v8 = vsel %vm4446_vm0, 4294967295, %v5637_v8  ;;  %vm989_vm5 = vcmp.eq.s32.totalorder %v4075_v0, %v4434_v4  ;;  %vm863_vm0 = vcmp.eq.s32.totalorder %v4115_v14, %v671_v63  ;;  %vm4470_vm8 = vmpackc.low %vm1004_vm14, %vm1000_vm7 }
  0xe4   : > { %vm3428_vm15 = vmpackc.low %vm994_vm12, %vm990_vm1  ;;  %vm867_vm12 = vcmp.eq.s32.totalorder %v4115_v14, %v674_v62  ;;  %v5642_v16 = vsel %vm4470_vm8, 4294967295, %v5641_v16  ;;  %v5663_v62 = vmov 0  ;;  %v5665_v63 = vmov 0 }
  0xe5   : > { %3429 = vmatprep.subr.msk.bf16.mxu1 %vm3428_vm15, %v5559_v12  ;;  %vm3430_vm10 = vmpackc.low %vm993_vm11, %vm989_vm5  ;;  %v764_v10 = vpop.permute.xlu1 %763  ;;  %vm1003_vm15 = vcmp.eq.s32.totalorder %v4115_v14, %v4381_v57 }
  0xe6   : > { %3431 = vmatpush1.bf16.msk.msra.mxu1 %vm3430_vm10, %v5559_v12  ;;  %v761_v11 = vpop.permute.xlu0 %760  ;;  %vm4462_vm1 = vmpackc.low %vm868_vm4, %vm864_vm13  ;;  %vm986_vm2 = vcmp.eq.s32.totalorder %v4091_v7, %v764_v10  ;;  %vm999_vm13 = vcmp.eq.s32.totalorder %v4115_v14, %v4384_v58  ;;  %vm985_vm11 = vcmp.eq.s32.totalorder %v4075_v0, %v764_v10 }
  0xe7   : > { %v5640_v15 = vsel %vm4462_vm1, 4294967295, %v5639_v15  ;;  %vm982_vm3 = vcmp.eq.s32.totalorder %v4091_v7, %v761_v11  ;;  %vm981_vm5 = vcmp.eq.s32.totalorder %v4075_v0, %v761_v11  ;;  %vm4488_vm7 = vmpackc.low %vm867_vm12, %vm863_vm0 }
  0xe8   : > { %vm3368_vm4 = vmpackc.low %vm986_vm2, %vm982_vm3  ;;  %v5644_v21 = vsel %vm4488_vm7, 4294967295, %v5643_v21 }
  0xe9   : > { %3369 = vmatprep.subr.msk.bf16.mxu0 %vm3368_vm4, %v5559_v12  ;;  %vm3370_vm10 = vmpackc.low %vm985_vm11, %vm981_vm5  ;;  %v4481_v17 = vpop.permute.xlu1 %859  ;;  %vm984_vm4 = vcmp.eq.s32.totalorder %v4112_v13, %v761_v11  ;;  %vm988_vm5 = vcmp.eq.s32.totalorder %v4112_v13, %v764_v10 }
  0xea   : > { %3371 = vmatpush2.bf16.msk.msra.mxu0 %vm3370_vm10, %v5559_v12  ;;  %v4484_v18 = vpop.permute.xlu0 %856  ;;  %vm1114_vm3 = vcmp.eq.s32.totalorder %v4091_v7, %v4481_v17  ;;  %vm4496_vm14 = vmpackc.low %vm1003_vm15, %vm999_vm13  ;;  %vm1113_vm12 = vcmp.eq.s32.totalorder %v4075_v0, %v4481_v17  ;;  %vm992_vm10 = vcmp.eq.s32.totalorder %v4112_v13, %v4434_v4  ;;  %vm996_vm15 = vcmp.eq.s32.totalorder %v4112_v13, %v4431_v3 }
  0xeb   : > { %vm1110_vm2 = vcmp.eq.s32.totalorder %v4091_v7, %v4484_v18  ;;  %v5646_v22 = vsel %vm4496_vm14, 4294967295, %v5645_v22  ;;  %vm1109_vm0 = vcmp.eq.s32.totalorder %v4075_v0, %v4484_v18  ;;  %vm983_vm14 = vcmp.eq.s32.totalorder %v4115_v14, %v761_v11  ;;  %vm4520_vm1 = vmpackc.low %vm996_vm15, %vm992_vm10 }
  0xec   : > { %vm3432_vm11 = vmpackc.low %vm1114_vm3, %vm1110_vm2  ;;  %vm987_vm3 = vcmp.eq.s32.totalorder %v4115_v14, %v764_v10  ;;  %v5650_v30 = vsel %vm4520_vm1, 4294967295, %v5649_v30  ;;  %v5667_v10 = vmov 0  ;;  %v5669_v11 = vmov 0 }
  0xed   : > { %3433 = vmatprep.subr.msk.bf16.mxu1 %vm3432_vm11, %v5559_v12  ;;  %vm3434_vm13 = vmpackc.low %vm1113_vm12, %vm1109_vm0  ;;  %v758_v25 = vpop.permute.xlu1 %757  ;;  %vm995_vm11 = vcmp.eq.s32.totalorder %v4115_v14, %v4431_v3 }
  0xee   : > { %3435 = vmatpush2.bf16.msk.msra.mxu1 %vm3434_vm13, %v5559_v12  ;;  %v755_v26 = vpop.permute.xlu0 %754  ;;  %vm4512_vm2 = vmpackc.low %vm988_vm5, %vm984_vm4  ;;  %vm978_vm8 = vcmp.eq.s32.totalorder %v4091_v7, %v758_v25  ;;  %vm991_vm4 = vcmp.eq.s32.totalorder %v4115_v14, %v4434_v4  ;;  %vm977_vm12 = vcmp.eq.s32.totalorder %v4075_v0, %v758_v25 }
  0xef   : > { %v5648_v29 = vsel %vm4512_vm2, 4294967295, %v5647_v29  ;;  %vm974_vm7 = vcmp.eq.s32.totalorder %v4091_v7, %v755_v26  ;;  %vm973_vm0 = vcmp.eq.s32.totalorder %v4075_v0, %v755_v26  ;;  %vm4538_vm10 = vmpackc.low %vm987_vm3, %vm983_vm14 }
  0xf0   : > { %vm3372_vm5 = vmpackc.low %vm978_vm8, %vm974_vm7  ;;  %v5652_v37 = vsel %vm4538_vm10, 4294967295, %v5651_v37 }
  0xf1   : > { %3373 = vmatprep.subr.msk.bf16.mxu0 %vm3372_vm5, %v5559_v12  ;;  %vm3374_vm13 = vmpackc.low %vm977_vm12, %vm973_vm0  ;;  %v4531_v33 = vpop.permute.xlu1 %853  ;;  %vm976_vm5 = vcmp.eq.s32.totalorder %v4112_v13, %v755_v26  ;;  %vm980_vm0 = vcmp.eq.s32.totalorder %v4112_v13, %v758_v25 }
  0xf2   : > { %3375 = vmatpush2.bf16.msk.msra.mxu0 %vm3374_vm13, %v5559_v12  ;;  %v4534_v34 = vpop.permute.xlu0 %850  ;;  %vm1106_vm7 = vcmp.eq.s32.totalorder %v4091_v7, %v4531_v33  ;;  %vm4546_vm15 = vmpackc.low %vm995_vm11, %vm991_vm4  ;;  %vm1105_vm3 = vcmp.eq.s32.totalorder %v4075_v0, %v4531_v33  ;;  %vm1112_vm13 = vcmp.eq.s32.totalorder %v4112_v13, %v4484_v18  ;;  %vm1116_vm11 = vcmp.eq.s32.totalorder %v4112_v13, %v4481_v17 }
  0xf3   : > { %vm1102_vm8 = vcmp.eq.s32.totalorder %v4091_v7, %v4534_v34  ;;  %v5654_v38 = vsel %vm4546_vm15, 4294967295, %v5653_v38  ;;  %vm1101_vm14 = vcmp.eq.s32.totalorder %v4075_v0, %v4534_v34  ;;  %vm975_vm15 = vcmp.eq.s32.totalorder %v4115_v14, %v755_v26  ;;  %vm4570_vm2 = vmpackc.low %vm1116_vm11, %vm1112_vm13 }
  0xf4   : > { %vm3436_vm12 = vmpackc.low %vm1106_vm7, %vm1102_vm8  ;;  %vm979_vm7 = vcmp.eq.s32.totalorder %v4115_v14, %v758_v25  ;;  %v5658_v46 = vsel %vm4570_vm2, 4294967295, %v5657_v46  ;;  %v5671_v25 = vmov 0  ;;  %v5673_v26 = vmov 0 }
  0xf5   : > { %3437 = vmatprep.subr.msk.bf16.mxu1 %vm3436_vm12, %v5559_v12  ;;  %vm3438_vm4 = vmpackc.low %vm1105_vm3, %vm1101_vm14  ;;  %v752_v41 = vpop.permute.xlu1 %751  ;;  %vm1115_vm12 = vcmp.eq.s32.totalorder %v4115_v14, %v4481_v17 }
  0xf6   : > { %3439 = vmatpush2.bf16.msk.msra.mxu1 %vm3438_vm4, %v5559_v12  ;;  %v749_v42 = vpop.permute.xlu0 %748  ;;  %vm4562_vm8 = vmpackc.low %vm980_vm0, %vm976_vm5  ;;  %vm970_vm1 = vcmp.eq.s32.totalorder %v4091_v7, %v752_v41  ;;  %vm1111_vm5 = vcmp.eq.s32.totalorder %v4115_v14, %v4484_v18  ;;  %vm969_vm3 = vcmp.eq.s32.totalorder %v4075_v0, %v752_v41 }
  0xf7   : > { %v5656_v45 = vsel %vm4562_vm8, 4294967295, %v5655_v45  ;;  %vm966_vm10 = vcmp.eq.s32.totalorder %v4091_v7, %v749_v42  ;;  %vm965_vm14 = vcmp.eq.s32.totalorder %v4075_v0, %v749_v42  ;;  %vm4588_vm13 = vmpackc.low %vm979_vm7, %vm975_vm15 }
  0xf8   : > { %vm3376_vm0 = vmpackc.low %vm970_vm1, %vm966_vm10  ;;  %v5660_v53 = vsel %vm4588_vm13, 4294967295, %v5659_v53 }
  0xf9   : > { %3377 = vmatprep.subr.msk.bf16.mxu0 %vm3376_vm0, %v5559_v12  ;;  %vm3378_vm4 = vmpackc.low %vm969_vm3, %vm965_vm14  ;;  %v4581_v49 = vpop.permute.xlu1 %847  ;;  %vm968_vm0 = vcmp.eq.s32.totalorder %v4112_v13, %v749_v42  ;;  %vm972_vm14 = vcmp.eq.s32.totalorder %v4112_v13, %v752_v41 }
  0xfa   : > { %3379 = vmatpush2.bf16.msk.msra.mxu0 %vm3378_vm4, %v5559_v12  ;;  %v4584_v50 = vpop.permute.xlu0 %844  ;;  %vm1098_vm10 = vcmp.eq.s32.totalorder %v4091_v7, %v4581_v49  ;;  %vm4596_vm11 = vmpackc.low %vm1115_vm12, %vm1111_vm5  ;;  %vm1097_vm7 = vcmp.eq.s32.totalorder %v4075_v0, %v4581_v49  ;;  %vm1104_vm4 = vcmp.eq.s32.totalorder %v4112_v13, %v4534_v34  ;;  %vm1108_vm12 = vcmp.eq.s32.totalorder %v4112_v13, %v4531_v33 }
  0xfb   : > { %vm1094_vm1 = vcmp.eq.s32.totalorder %v4091_v7, %v4584_v50  ;;  %v5662_v54 = vsel %vm4596_vm11, 4294967295, %v5661_v54  ;;  %vm1093_vm15 = vcmp.eq.s32.totalorder %v4075_v0, %v4584_v50  ;;  %vm967_vm11 = vcmp.eq.s32.totalorder %v4115_v14, %v749_v42  ;;  %vm4620_vm8 = vmpackc.low %vm1108_vm12, %vm1104_vm4 }
  0xfc   : > { %vm3440_vm3 = vmpackc.low %vm1098_vm10, %vm1094_vm1  ;;  %vm971_vm10 = vcmp.eq.s32.totalorder %v4115_v14, %v752_v41  ;;  %v5666_v63 = vsel %vm4620_vm8, 4294967295, %v5665_v63  ;;  %v5676_v41 = vmov 0  ;;  %v5679_v42 = vmov 0 }
  0xfd   : > { %3441 = vmatprep.subr.msk.bf16.mxu1 %vm3440_vm3, %v5559_v12  ;;  %vm3442_vm5 = vmpackc.low %vm1097_vm7, %vm1093_vm15  ;;  %v746_v57 = vpop.permute.xlu1 %745  ;;  %vm1107_vm3 = vcmp.eq.s32.totalorder %v4115_v14, %v4531_v33 }
  0xfe   : > { %3443 = vmatpush2.bf16.msk.msra.mxu1 %vm3442_vm5, %v5559_v12  ;;  %v743_v58 = vpop.permute.xlu0 %742  ;;  %vm4612_vm1 = vmpackc.low %vm972_vm14, %vm968_vm0  ;;  %vm962_vm2 = vcmp.eq.s32.totalorder %v4091_v7, %v746_v57  ;;  %vm1103_vm0 = vcmp.eq.s32.totalorder %v4115_v14, %v4534_v34  ;;  %vm961_vm7 = vcmp.eq.s32.totalorder %v4075_v0, %v746_v57 }
  0xff   : > { %v5664_v62 = vsel %vm4612_vm1, 4294967295, %v5663_v62  ;;  %vm958_vm13 = vcmp.eq.s32.totalorder %v4091_v7, %v743_v58  ;;  %vm957_vm15 = vcmp.eq.s32.totalorder %v4075_v0, %v743_v58  ;;  %vm4638_vm4 = vmpackc.low %vm971_vm10, %vm967_vm11 }
 0x100   : > { %vm3380_vm14 = vmpackc.low %vm962_vm2, %vm958_vm13  ;;  %v5668_v10 = vsel %vm4638_vm4, 4294967295, %v5667_v10 }
 0x101   : > { %3381 = vmatprep.subr.msk.bf16.mxu0 %vm3380_vm14, %v5559_v12  ;;  %vm3382_vm5 = vmpackc.low %vm961_vm7, %vm957_vm15  ;;  %v4631_v3 = vpop.permute.xlu1 %841  ;;  %vm960_vm14 = vcmp.eq.s32.totalorder %v4112_v13, %v743_v58  ;;  %vm964_vm15 = vcmp.eq.s32.totalorder %v4112_v13, %v746_v57 }
 0x102   : > { %3383 = vmatpush2.bf16.msk.msra.mxu0 %vm3382_vm5, %v5559_v12  ;;  %v4634_v4 = vpop.permute.xlu0 %838  ;;  %vm1090_vm13 = vcmp.eq.s32.totalorder %v4091_v7, %v4631_v3  ;;  %vm4646_vm12 = vmpackc.low %vm1107_vm3, %vm1103_vm0  ;;  %vm1089_vm10 = vcmp.eq.s32.totalorder %v4075_v0, %v4631_v3  ;;  %vm1096_vm5 = vcmp.eq.s32.totalorder %v4112_v13, %v4584_v50  ;;  %vm1100_vm3 = vcmp.eq.s32.totalorder %v4112_v13, %v4581_v49 }
 0x103   : > { %vm1086_vm2 = vcmp.eq.s32.totalorder %v4091_v7, %v4634_v4  ;;  %v5670_v11 = vsel %vm4646_vm12, 4294967295, %v5669_v11  ;;  %vm1085_vm11 = vcmp.eq.s32.totalorder %v4075_v0, %v4634_v4  ;;  %vm959_vm12 = vcmp.eq.s32.totalorder %v4115_v14, %v743_v58  ;;  %vm4670_vm1 = vmpackc.low %vm1100_vm3, %vm1096_vm5 }
 0x104   : > { %vm3444_vm7 = vmpackc.low %vm1090_vm13, %vm1086_vm2  ;;  %vm963_vm13 = vcmp.eq.s32.totalorder %v4115_v14, %v746_v57  ;;  %v5674_v26 = vsel %vm4670_vm1, 4294967295, %v5673_v26  ;;  %v5682_v57 = vmov 0  ;;  %v5685_v58 = vmov 0 }
 0x105   : > { %3445 = vmatprep.subr.msk.bf16.mxu1 %vm3444_vm7, %v5559_v12  ;;  %vm3446_vm0 = vmpackc.low %vm1089_vm10, %vm1085_vm11  ;;  %v740_v17 = vpop.permute.xlu1 %739  ;;  %5675 = vst [vmem:[#allocation14_spill] sm:$0xff] %v5674_v26  ;;  %vm1099_vm7 = vcmp.eq.s32.totalorder %v4115_v14, %v4581_v49  ;;  %v5715_v26 = vmov 0 }
 0x106   : > { %3447 = vmatpush2.bf16.msk.msra.mxu1 %vm3446_vm0, %v5559_v12  ;;  %v737_v18 = vpop.permute.xlu0 %736  ;;  %vm4662_vm2 = vmpackc.low %vm964_vm15, %vm960_vm14  ;;  %vm954_vm8 = vcmp.eq.s32.totalorder %v4091_v7, %v740_v17  ;;  %vm1095_vm14 = vcmp.eq.s32.totalorder %v4115_v14, %v4584_v50  ;;  %vm953_vm10 = vcmp.eq.s32.totalorder %v4075_v0, %v740_v17 }
 0x107   : > { %v5672_v25 = vsel %vm4662_vm2, 4294967295, %v5671_v25  ;;  %vm950_vm4 = vcmp.eq.s32.totalorder %v4091_v7, %v737_v18  ;;  %vm949_vm11 = vcmp.eq.s32.totalorder %v4075_v0, %v737_v18  ;;  %vm4688_vm5 = vmpackc.low %vm963_vm13, %vm959_vm12 }
 0x108   : > { %vm3384_vm15 = vmpackc.low %vm954_vm8, %vm950_vm4  ;;  %v5677_v41 = vsel %vm4688_vm5, 4294967295, %v5676_v41 }
 0x109   : > { %3385 = vmatprep.subr.msk.bf16.mxu0 %vm3384_vm15, %v5559_v12  ;;  %vm3386_vm0 = vmpackc.low %vm953_vm10, %vm949_vm11  ;;  %v4681_v33 = vpop.permute.xlu1 %835  ;;  %5678 = vst [vmem:[#allocation15_spill] sm:$0xff] %v5677_v41  ;;  %vm952_vm15 = vcmp.eq.s32.totalorder %v4112_v13, %v737_v18  ;;  %vm956_vm11 = vcmp.eq.s32.totalorder %v4112_v13, %v740_v17  ;;  %v662_v41 = vld [vmem:[%s4083_s24 + $0x10] sm:$0xff] }
 0x10a   : > { %3387 = vmatpush2.bf16.msk.msra.mxu0 %vm3386_vm0, %v5559_v12  ;;  %v4684_v34 = vpop.permute.xlu0 %832  ;;  %vm1082_vm4 = vcmp.eq.s32.totalorder %v4091_v7, %v4681_v33  ;;  %vm4696_vm3 = vmpackc.low %vm1099_vm7, %vm1095_vm14  ;;  %vm1081_vm13 = vcmp.eq.s32.totalorder %v4075_v0, %v4681_v33  ;;  %vm1088_vm0 = vcmp.eq.s32.totalorder %v4112_v13, %v4634_v4  ;;  %vm1092_vm7 = vcmp.eq.s32.totalorder %v4112_v13, %v4631_v3 }
 0x10b   : > { %vm1078_vm8 = vcmp.eq.s32.totalorder %v4091_v7, %v4684_v34  ;;  %v5680_v42 = vsel %vm4696_vm3, 4294967295, %v5679_v42  ;;  %vm1077_vm12 = vcmp.eq.s32.totalorder %v4075_v0, %v4684_v34  ;;  %vm951_vm3 = vcmp.eq.s32.totalorder %v4115_v14, %v737_v18  ;;  %vm4720_vm2 = vmpackc.low %vm1092_vm7, %vm1088_vm0 }
 0x10c   : > { %5681 = vst [vmem:[#allocation16_spill] sm:$0xff] %v5680_v42  ;;  %vm3448_vm10 = vmpackc.low %vm1082_vm4, %vm1078_vm8  ;;  %vm955_vm4 = vcmp.eq.s32.totalorder %v4115_v14, %v740_v17  ;;  %v5686_v58 = vsel %vm4720_vm2, 4294967295, %v5685_v58 }
 0x10d   : > { %3449 = vmatprep.subr.msk.bf16.mxu1 %vm3448_vm10, %v5559_v12  ;;  %vm3450_vm14 = vmpackc.low %vm1081_vm13, %vm1077_vm12  ;;  %v734_v49 = vpop.permute.xlu1 %733  ;;  %5687 = vst [vmem:[#allocation18_spill] sm:$0xff] %v5686_v58  ;;  %vm1091_vm10 = vcmp.eq.s32.totalorder %v4115_v14, %v4631_v3  ;;  %v5688_v3 = vmov 0  ;;  %v5697_v58 = vmov 0 }
 0x10e   : > { %3451 = vmatpush2.bf16.msk.msra.mxu1 %vm3450_vm14, %v5559_v12  ;;  %v731_v50 = vpop.permute.xlu0 %730  ;;  %vm4712_vm8 = vmpackc.low %vm956_vm11, %vm952_vm15  ;;  %vm946_vm1 = vcmp.eq.s32.totalorder %v4091_v7, %v734_v49  ;;  %vm1087_vm15 = vcmp.eq.s32.totalorder %v4115_v14, %v4634_v4  ;;  %vm945_vm13 = vcmp.eq.s32.totalorder %v4075_v0, %v734_v49  ;;  %v5691_v4 = vmov 0 }
 0x10f   : > { %v5683_v57 = vsel %vm4712_vm8, 4294967295, %v5682_v57  ;;  %vm942_vm5 = vcmp.eq.s32.totalorder %v4091_v7, %v731_v50  ;;  %vm941_vm12 = vcmp.eq.s32.totalorder %v4075_v0, %v731_v50  ;;  %vm4738_vm0 = vmpackc.low %vm955_vm4, %vm951_vm3 }
 0x110   : > { %5684 = vst [vmem:[#allocation17_spill] sm:$0xff] %v5683_v57  ;;  %vm3388_vm11 = vmpackc.low %vm946_vm1, %vm942_vm5  ;;  %v5689_v3 = vsel %vm4738_vm0, 4294967295, %v5688_v3 }
 0x111   : > { %3389 = vmatprep.subr.msk.bf16.mxu0 %vm3388_vm11, %v5559_v12  ;;  %vm3390_vm14 = vmpackc.low %vm945_vm13, %vm941_vm12  ;;  %v4731_v18 = vpop.permute.xlu1 %829  ;;  %5690 = vst [vmem:[#allocation19_spill] sm:$0xff] %v5689_v3  ;;  %vm944_vm11 = vcmp.eq.s32.totalorder %v4112_v13, %v731_v50  ;;  %vm948_vm12 = vcmp.eq.s32.totalorder %v4112_v13, %v734_v49  ;;  %v5694_v3 = vmov 0 }
 0x112   : > { %3391 = vmatpush2.bf16.msk.msra.mxu0 %vm3390_vm14, %v5559_v12  ;;  %v4734_v61 = vpop.permute.xlu0 %826  ;;  %vm1074_vm5 = vcmp.eq.s32.totalorder %v4091_v7, %v4731_v18  ;;  %vm4746_vm7 = vmpackc.low %vm1091_vm10, %vm1087_vm15  ;;  %vm1073_vm4 = vcmp.eq.s32.totalorder %v4075_v0, %v4731_v18  ;;  %vm1080_vm14 = vcmp.eq.s32.totalorder %v4112_v13, %v4684_v34  ;;  %vm1084_vm10 = vcmp.eq.s32.totalorder %v4112_v13, %v4681_v33 }
 0x113   : > { %vm1070_vm1 = vcmp.eq.s32.totalorder %v4091_v7, %v4734_v61  ;;  %v5692_v4 = vsel %vm4746_vm7, 4294967295, %v5691_v4  ;;  %vm1069_vm3 = vcmp.eq.s32.totalorder %v4075_v0, %v4734_v61  ;;  %vm943_vm7 = vcmp.eq.s32.totalorder %v4115_v14, %v731_v50  ;;  %vm4770_vm8 = vmpackc.low %vm1084_vm10, %vm1080_vm14  ;;  %v5770_v20 = vld [vmem:[#allocation16_spill] sm:$0xff] }
 0x114   : > { %5693 = vst [vmem:[#allocation20_spill] sm:$0xff] %v5692_v4  ;;  %vm3452_vm13 = vmpackc.low %vm1074_vm5, %vm1070_vm1  ;;  %vm947_vm5 = vcmp.eq.s32.totalorder %v4115_v14, %v734_v49  ;;  %v5698_v58 = vsel %vm4770_vm8, 4294967295, %v5697_v58 }
 0x115   : > { %3453 = vmatprep.subr.msk.bf16.mxu1 %vm3452_vm13, %v5559_v12  ;;  %vm3454_vm15 = vmpackc.low %vm1073_vm4, %vm1069_vm3  ;;  %v728_v17 = vpop.permute.xlu1 %727  ;;  %5699 = vst [vmem:[#allocation22_spill] sm:$0xff] %v5698_v58  ;;  %vm1083_vm13 = vcmp.eq.s32.totalorder %v4115_v14, %v4681_v33  ;;  %v5700_v33 = vmov 0  ;;  %v5706_v58 = vmov 0 }
 0x116   : > { %3455 = vmatpush2.bf16.msk.msra.mxu1 %vm3454_vm15, %v5559_v12  ;;  %v725_v4 = vpop.permute.xlu0 %724  ;;  %vm4762_vm1 = vmpackc.low %vm948_vm12, %vm944_vm11  ;;  %vm938_vm2 = vcmp.eq.s32.totalorder %v4091_v7, %v728_v17  ;;  %vm1079_vm11 = vcmp.eq.s32.totalorder %v4115_v14, %v4684_v34  ;;  %vm937_vm4 = vcmp.eq.s32.totalorder %v4075_v0, %v728_v17  ;;  %v5703_v34 = vmov 0 }
 0x117   : > { %v5695_v3 = vsel %vm4762_vm1, 4294967295, %v5694_v3  ;;  %vm934_vm0 = vcmp.eq.s32.totalorder %v4091_v7, %v725_v4  ;;  %vm933_vm3 = vcmp.eq.s32.totalorder %v4075_v0, %v725_v4  ;;  %vm4786_vm14 = vmpackc.low %vm947_vm5, %vm943_vm7 }
 0x118   : > { %5696 = vst [vmem:[#allocation21_spill] sm:$0xff] %v5695_v3  ;;  %vm3392_vm12 = vmpackc.low %vm938_vm2, %vm934_vm0  ;;  %v5701_v33 = vsel %vm4786_vm14, 4294967295, %v5700_v33  ;;  %vm1076_vm14 = vcmp.eq.s32.totalorder %v4112_v13, %v4731_v18 }
 0x119   : > { %3393 = vmatprep.subr.msk.bf16.mxu0 %vm3392_vm12, %v5559_v12  ;;  %vm3394_vm15 = vmpackc.low %vm937_vm4, %vm933_vm3  ;;  %v4781_v50 = vpop.permute.xlu1 %823  ;;  %5702 = vst [vmem:[#allocation23_spill] sm:$0xff] %v5701_v33  ;;  %vm936_vm12 = vcmp.eq.s32.totalorder %v4112_v13, %v725_v4  ;;  %vm940_vm3 = vcmp.eq.s32.totalorder %v4112_v13, %v728_v17  ;;  %v660_v33 = vld [vmem:[%s4083_s24] sm:$0xff] }
 0x11a   : > { %3395 = vmatpush2.bf16.msk.msra.mxu0 %vm3394_vm15, %v5559_v12  ;;  %v821_v3 = vpop.permute.xlu0 %820  ;;  %vm1066_vm0 = vcmp.eq.s32.totalorder %v4091_v7, %v4781_v50  ;;  %vm4793_vm10 = vmpackc.low %vm1083_vm13, %vm1079_vm11  ;;  %vm1065_vm5 = vcmp.eq.s32.totalorder %v4075_v0, %v4781_v50  ;;  %vm1072_vm15 = vcmp.eq.s32.totalorder %v4112_v13, %v4734_v61  ;;  %v4836_v57 = vpack.c.bf16 %v660_v33, %v660_v33 }
 0x11b   : > { %vm1062_vm2 = vcmp.eq.s32.totalorder %v4091_v7, %v821_v3  ;;  %v5704_v34 = vsel %vm4793_vm10, 4294967295, %v5703_v34  ;;  %vm1061_vm7 = vcmp.eq.s32.totalorder %v4075_v0, %v821_v3  ;;  %vm4813_vm11 = vmpackc.low %vm940_vm3, %vm936_vm12  ;;  %vm1075_vm12 = vcmp.eq.s32.totalorder %v4115_v14, %v4731_v18 }
 0x11c   : > { %5705 = vst [vmem:[#allocation24_spill] sm:$0xff] %v5704_v34  ;;  %vm3456_vm4 = vmpackc.low %vm1066_vm0, %vm1062_vm2  ;;  %v5707_v58 = vsel %vm4813_vm11, 4294967295, %v5706_v58  ;;  %vm1071_vm3 = vcmp.eq.s32.totalorder %v4115_v14, %v4734_v61  ;;  %v4882_v61 = vpack.c.bf16 %v662_v41, %v662_v41 }
 0x11d   : > { %3457 = vmatprep.subr.msk.bf16.mxu1 %vm3456_vm4, %v5559_v12  ;;  %vm3458_vm13 = vmpackc.low %vm1065_vm5, %vm1061_vm7  ;;  %v4807_v49 = vpop.permute.xlu1 %721  ;;  %5708 = vst [vmem:[#allocation25_spill] sm:$0xff] %v5707_v58  ;;  %v5712_v58 = vmov 1.0|1.0  }
 0x11e   : > { %3459 = vmatpush2.bf16.msk.msra.mxu1 %vm3458_vm13, %v5559_v12  ;;  %v4810_v34 = vpop.permute.xlu0 %718  ;;  %vm930_vm7 = vcmp.eq.s32.totalorder %v4091_v7, %v4807_v49  ;;  %vm4823_vm5 = vmpackc.low %vm1076_vm14, %vm1072_vm15  ;;  %v5709_v12 = vmov 0  ;;  %vm929_vm0 = vcmp.eq.s32.totalorder %v4075_v0, %v4807_v49  ;;  %vm5713_vm14 = vcmp.eq.s32.totalorder %v4115_v14, %v725_v4 }
 0x11f   : > { %vm926_vm4 = vcmp.eq.s32.totalorder %v4091_v7, %v4810_v34  ;;  %v5710_v12 = vsel %vm4823_vm5, 4294967295, %v5709_v12  ;;  %vm925_vm2 = vcmp.eq.s32.totalorder %v4075_v0, %v4810_v34  ;;  %vm5714_vm15 = vcmp.eq.s32.totalorder %v4115_v14, %v728_v17 }
 0x120   : > { %5711 = vst [vmem:[#allocation26_spill] sm:$0xff] %v5710_v12  ;;  %vm3396_vm13 = vmpackc.low %vm930_vm7, %vm926_vm4  ;;  %v5717_v4 = vmov 0 }
 0x121   : > { %3397 = vmatprep.subr.msk.bf16.mxu0 %vm3396_vm13, %v5712_v58  ;;  %vm3398_vm11 = vmpackc.low %vm929_vm0, %vm925_vm2  ;;  %v4838_v42 = vpop.permute.xlu1 %817 }
 0x122   : > { %3399 = vmatpush2.bf16.msk.msra.mxu0 %vm3398_vm11, %v5712_v58  ;;  %v4841_v12 = vpop.permute.xlu0 %814  ;;  %vm4848_vm4 = vmpackc.low %vm5714_vm15, %vm5713_vm14  ;;  %vm1058_vm11 = vcmp.eq.s32.totalorder %v4091_v7, %v4838_v42  ;;  %vm1057_vm13 = vcmp.eq.s32.totalorder %v4075_v0, %v4838_v42  ;;  %vm1064_vm14 = vcmp.eq.s32.totalorder %v4112_v13, %v821_v3  ;;  %vm1068_vm15 = vcmp.eq.s32.totalorder %v4112_v13, %v4781_v50 }
 0x123   : > { %v5716_v26 = vsel %vm4848_vm4, 4294967295, %v5715_v26  ;;  %3465 = vmatprep.subr.msk.bf16.mxu0 %vm4135_vm6, %v5712_v58  ;;  %vm1054_vm2 = vcmp.eq.s32.totalorder %v4091_v7, %v4841_v12  ;;  %vm4865_vm0 = vmpackc.low %vm1075_vm12, %vm1071_vm3  ;;  %vm1053_vm6 = vcmp.eq.s32.totalorder %v4075_v0, %v4841_v12  ;;  %vm931_vm4 = vcmp.eq.s32.totalorder %v4115_v14, %v4807_v49 }
 0x124   : > { %v5718_v4 = vsel %vm4865_vm0, 4294967295, %v5717_v4  ;;  %vm3460_vm7 = vmpackc.low %vm1058_vm11, %vm1054_vm2  ;;  %vm927_vm12 = vcmp.eq.s32.totalorder %v4115_v14, %v4810_v34  ;;  %vm1067_vm2 = vcmp.eq.s32.totalorder %v4115_v14, %v4781_v50  ;;  %vm1063_vm11 = vcmp.eq.s32.totalorder %v4115_v14, %v821_v3 }
 0x125   : > { %1798 = vmatmul.mubr.bf16.vlgmr.msra.gmra.mxu0 %v4836_v57  ;;  %3461 = vmatprep.subr.msk.bf16.mxu1 %vm3460_vm7, %v5712_v58  ;;  %vm3462_vm3 = vmpackc.low %vm1057_vm13, %vm1053_vm6  ;;  %vm5719_vm0 = vnez %v5592_v23  ;;  %vm5720_vm7 = vnez %v5594_v24  ;;  %v5772_v23 = vld [vmem:[#allocation17_spill] sm:$0xff]  ;;  %v5774_v24 = vld [vmem:[#allocation18_spill] sm:$0xff] }
 0x126   : > { %3463 = vmatpush2.bf16.msk.msra.mxu1 %vm3462_vm3, %v5712_v58  ;;  %3467 = vmatpush1.bf16.msk.msra.mxu0 %vm4146_vm9, %v5712_v58  ;;  %vm4897_vm6 = vmpackc.low %vm1068_vm15, %vm1064_vm14  ;;  %vm5728_vm14 = vnez %v5598_v28  ;;  %vm5730_vm15 = vnez %v5602_v32  ;;  %vm5732_vm3 = vnez %v5606_v36  ;;  %v5778_v28 = vld [vmem:[#allocation20_spill] sm:$0xff]  ;;  %v2057_v32 = vld [vmem:[%s5796_s6 + $0x18] sm:$0xff] }
 0x127   : > { %3469 = vmatprep.subr.msk.bf16.mxu0 %vm5719_vm0, %v5712_v58  ;;  %3529 = vmatprep.subr.msk.bf16.mxu1 %vm5720_vm7, %v5712_v58  ;;  %vm4901_vm13 = vmpackc.low %vm931_vm4, %vm927_vm12  ;;  %vm5727_vm0 = vnez %v5596_v27  ;;  %vm5729_vm4 = vnez %v5600_v31  ;;  %vm5731_vm12 = vnez %v5604_v35  ;;  %vm5735_vm7 = vnez %v5612_v43  ;;  %v5776_v27 = vld [vmem:[#allocation19_spill] sm:$0xff]  ;;  %v2056_v31 = vld [vmem:[%s5796_s6 + $0x10] sm:$0xff] }
 0x128   : > { %1879 = vmatprep.mubr.bf16.mxu0 %v4088_v6  ;;  %vm4907_vm9 = vmpackc.low %vm1067_vm2, %vm1063_vm11  ;;  %vm5733_vm2 = vnez %v5608_v39  ;;  %vm5734_vm11 = vnez %v5610_v40  ;;  %v5766_v6 = vld [vmem:[#allocation14_spill] sm:$0xff]  ;;  %v5782_v35 = vld [vmem:[#allocation23_spill] sm:$0xff] }
 0x129   : > { %1839 = vmatmul.mubr.bf16.vlgmr.msra.gmra.mxu1 %v4882_v61  ;;  %v5785_v39 = vld [vmem:[#allocation25_spill] sm:$0xff] }
 0x12a   : > { %3471 = vmatpush1.bf16.msk.msra.mxu0 %vm5727_vm0, %v5712_v58  ;;  %3531 = vmatpush1.bf16.msk.msra.mxu1 %vm5728_vm14, %v5712_v58  ;;  %vm5736_vm0 = vnez %v5614_v44  ;;  %vm5737_vm14 = vnez %v5616_v47 }
 0x12b   : > { %3473 = vmatprep.subr.msk.bf16.mxu0 %vm5729_vm4, %v5712_v58  ;;  %3533 = vmatprep.subr.msk.bf16.mxu1 %vm5730_vm15, %v5712_v58  ;;  %vm5738_vm4 = vnez %v5618_v48  ;;  %vm5739_vm15 = vnez %v5620_v51 }
 0x12c   : > { %1920 = vmatprep.mubr.bf16.mxu1 %v4095_v9  ;;  %v5768_v9 = vld [vmem:[#allocation15_spill] sm:$0xff] }
 0x12e   : > { %3475 = vmatpush1.bf16.msk.msra.mxu0 %vm5731_vm12, %v5712_v58  ;;  %3535 = vmatpush1.bf16.msk.msra.mxu1 %vm5732_vm3, %v5712_v58  ;;  %vm5740_vm12 = vnez %v5622_v52  ;;  %vm5741_vm3 = vnez %v5624_v55  ;;  %v3859_v52 = vmov 0.0   ;;  %v2001_v55 = vld [vmem:[%s5542_s8 + $0x18] sm:$0xff] }
 0x12f   : > { %3477 = vmatprep.subr.msk.bf16.mxu0 %vm5733_vm2, %v5712_v58  ;;  %3537 = vmatprep.subr.msk.bf16.mxu1 %vm5734_vm11, %v5712_v58  ;;  %vm5742_vm2 = vnez %v5626_v56  ;;  %vm5743_vm11 = vnez %v5628_v59  ;;  %v2029_v56 = vld [vmem:[%s5794_s7 + $0x18] sm:$0xff]  ;;  %v2000_v59 = vld [vmem:[%s5542_s8 + $0x10] sm:$0xff] }
 0x132   : > { %3479 = vmatpush1.bf16.msk.msra.mxu0 %vm5735_vm7, %v5712_v58  ;;  %3539 = vmatpush1.bf16.msk.msra.mxu1 %vm5736_vm0, %v5712_v58  ;;  %vm5744_vm7 = vnez %v5630_v60  ;;  %vm5745_vm0 = vnez %v5632_v1  ;;  %v3592_v60 = vld [vmem:[%s582_s0] ss:$0 sm:$0xff] }
 0x133   : > { %3481 = vmatprep.subr.msk.bf16.mxu0 %vm5737_vm14, %v5712_v58  ;;  %3541 = vmatprep.subr.msk.bf16.mxu1 %vm5738_vm4, %v5712_v58  ;;  %vm5746_vm14 = vnez %v5634_v2  ;;  %vm5747_vm4 = vnez %v5636_v5  ;;  %v2012_v2 = vmul.f32 %v3592_v60, %v2001_v55 }
 0x136   : > { %3483 = vmatpush1.bf16.msk.msra.mxu0 %vm5739_vm15, %v5712_v58  ;;  %3543 = vmatpush1.bf16.msk.msra.mxu1 %vm5740_vm12, %v5712_v58  ;;  %vm5748_vm15 = vnez %v5638_v8  ;;  %vm5749_vm12 = vnez %v5640_v15  ;;  %v2011_v8 = vmul.f32 %v3592_v60, %v2000_v59  ;;  %v2028_v15 = vld [vmem:[%s5794_s7 + $0x10] sm:$0xff] }
 0x137   : > { %3485 = vmatprep.subr.msk.bf16.mxu0 %vm5741_vm3, %v5712_v58  ;;  %3545 = vmatprep.subr.msk.bf16.mxu1 %vm5742_vm2, %v5712_v58  ;;  %vm5750_vm3 = vnez %v5642_v16  ;;  %vm5751_vm2 = vnez %v5644_v21  ;;  %v1999_v16 = vld [vmem:[%s5542_s8 + $0x8] sm:$0xff] }
 0x13a   : > { %3487 = vmatpush1.bf16.msk.msra.mxu0 %vm5743_vm11, %v5712_v58  ;;  %3547 = vmatpush1.bf16.msk.msra.mxu1 %vm5744_vm7, %v5712_v58  ;;  %vm5752_vm11 = vnez %v5646_v22  ;;  %vm5753_vm7 = vnez %v5648_v29  ;;  %v2027_v22 = vld [vmem:[%s5794_s7 + $0x8] sm:$0xff] }
 0x13b   : > { %3489 = vmatprep.subr.msk.bf16.mxu0 %vm5745_vm0, %v5712_v58  ;;  %3549 = vmatprep.subr.msk.bf16.mxu1 %vm5746_vm14, %v5712_v58  ;;  %vm5754_vm0 = vnez %v5650_v30  ;;  %vm5755_vm14 = vnez %v5652_v37 }
 0x13e   : > { %3491 = vmatpush1.bf16.msk.msra.mxu0 %vm5747_vm4, %v5712_v58  ;;  %3551 = vmatpush1.bf16.msk.msra.mxu1 %vm5748_vm15, %v5712_v58  ;;  %vm5756_vm4 = vnez %v5654_v38  ;;  %vm5757_vm15 = vnez %v5656_v45  ;;  %v2010_v38 = vmul.f32 %v3592_v60, %v1999_v16 }
 0x13f   : > { %3493 = vmatprep.subr.msk.bf16.mxu0 %vm5749_vm12, %v5712_v58  ;;  %3553 = vmatprep.subr.msk.bf16.mxu1 %vm5750_vm3, %v5712_v58  ;;  %vm5758_vm12 = vnez %v5658_v46  ;;  %vm5759_vm3 = vnez %v5660_v53  ;;  %v1998_v53 = vld [vmem:[%s5542_s8] sm:$0xff] }
 0x142   : > { %3495 = vmatpush1.bf16.msk.msra.mxu0 %vm5751_vm2, %v5712_v58  ;;  %3555 = vmatpush1.bf16.msk.msra.mxu1 %vm5752_vm11, %v5712_v58  ;;  %vm5760_vm2 = vnez %v5662_v54  ;;  %vm5761_vm11 = vnez %v5664_v62  ;;  %v2009_v62 = vmul.f32 %v3592_v60, %v1998_v53 }
 0x143   : > { %3497 = vmatprep.subr.msk.bf16.mxu0 %vm5753_vm7, %v5712_v58  ;;  %3557 = vmatprep.subr.msk.bf16.mxu1 %vm5754_vm0, %v5712_v58  ;;  %vm5762_vm7 = vnez %v5666_v63  ;;  %vm5763_vm0 = vnez %v5668_v10  ;;  %v2026_v10 = vld [vmem:[%s5794_s7] sm:$0xff] }
 0x146   : > { %3499 = vmatpush2.bf16.msk.msra.mxu0 %vm5755_vm14, %v5712_v58  ;;  %3559 = vmatpush1.bf16.msk.msra.mxu1 %vm5756_vm4, %v5712_v58  ;;  %vm5764_vm14 = vnez %v5670_v11  ;;  %vm5765_vm4 = vnez %v5672_v25 }
 0x147   : > { %3501 = vmatprep.subr.msk.bf16.mxu0 %vm5757_vm15, %v5712_v58  ;;  %3561 = vmatprep.subr.msk.bf16.mxu1 %vm5758_vm12, %v5712_v58  ;;  %vm5767_vm15 = vnez %v5766_v6  ;;  %vm5769_vm12 = vnez %v5768_v9 }
 0x14a   : > { %3503 = vmatpush2.bf16.msk.msra.mxu0 %vm5759_vm3, %v5712_v58  ;;  %3563 = vmatpush2.bf16.msk.msra.mxu1 %vm5760_vm2, %v5712_v58  ;;  %vm5771_vm3 = vnez %v5770_v20  ;;  %vm5773_vm2 = vnez %v5772_v23 }
 0x14b   : > { %3505 = vmatprep.subr.msk.bf16.mxu0 %vm5761_vm11, %v5712_v58  ;;  %3565 = vmatprep.subr.msk.bf16.mxu1 %vm5762_vm7, %v5712_v58  ;;  %vm5775_vm11 = vnez %v5774_v24  ;;  %vm5777_vm7 = vnez %v5776_v27  ;;  %v2054_v27 = vld [vmem:[%s5796_s6] sm:$0xff] }
 0x14e   : > { %3507 = vmatpush2.bf16.msk.msra.mxu0 %vm5763_vm0, %v5712_v58  ;;  %3567 = vmatpush2.bf16.msk.msra.mxu1 %vm5764_vm14, %v5712_v58  ;;  %vm5779_vm0 = vnez %v5778_v28  ;;  %vm5783_vm14 = vnez %v5782_v35  ;;  %v2055_v28 = vld [vmem:[%s5796_s6 + $0x8] sm:$0xff] }
 0x14f   : > { %3509 = vmatprep.subr.msk.bf16.mxu0 %vm5765_vm4, %v5712_v58  ;;  %3569 = vmatprep.subr.msk.bf16.mxu1 %vm5767_vm15, %v5712_v58  ;;  %vm5786_vm4 = vnez %v5785_v39  ;;  %vm5788_vm15 = vnez %v5716_v26 }
 0x152   : > { %3511 = vmatpush2.bf16.msk.msra.mxu0 %vm5769_vm12, %v5712_v58  ;;  %3571 = vmatpush2.bf16.msk.msra.mxu1 %vm5771_vm3, %v5712_v58  ;;  %vm1060_vm3 = vcmp.eq.s32.totalorder %v4112_v13, %v4838_v42 }
 0x153   : > { %3513 = vmatprep.subr.msk.bf16.mxu0 %vm5773_vm2, %v5712_v58  ;;  %3573 = vmatprep.subr.msk.bf16.mxu1 %vm5775_vm11, %v5712_v58  ;;  %vm1059_vm2 = vcmp.eq.s32.totalorder %v4115_v14, %v4838_v42  ;;  %vm1055_vm11 = vcmp.eq.s32.totalorder %v4115_v14, %v4841_v12  ;;  %v5795_v42 = vlaneseq }
 0x156   : > { %3515 = vmatpush2.bf16.msk.msra.mxu0 %vm5777_vm7, %v5712_v58  ;;  %3575 = vmatpush2.bf16.msk.msra.mxu1 %vm5779_vm0, %v5712_v58  ;;  %vm3590_vm7 = vmpackc.low %vm1059_vm2, %vm1055_vm11  ;;  %vm2087_vm0 = vcmask 1046528  }
 0x157   : > { %3517 = vmatprep.subr.msk.bf16.mxu0 %vm4762_vm1, %v5712_v58  ;;  %3577 = vmatprep.subr.msk.bf16.mxu1 %vm4770_vm8, %v5712_v58  ;;  %vm928_vm1 = vcmp.eq.s32.totalorder %v4112_v13, %v4810_v34  ;;  %vm932_vm8 = vcmp.eq.s32.totalorder %v4112_v13, %v4807_v49 }
 0x158   : > { %vm3524_vm12 = vmpackc.low %vm932_vm8, %vm928_vm1 }
 0x15a   : > { %3519 = vmatpush2.bf16.msk.msra.mxu0 %vm5783_vm14, %v5712_v58  ;;  %3579 = vmatpush2.bf16.msk.msra.mxu1 %vm4793_vm10, %v5712_v58  ;;  %vm5789_vm10 = vnez %v5718_v4  ;;  %vm2074_vm14 = vcmask 56320  }
 0x15b   : > { %3521 = vmatprep.subr.msk.bf16.mxu0 %vm5786_vm4, %v5712_v58  ;;  %3581 = vmatprep.subr.msk.bf16.mxu1 %vm4823_vm5, %v5712_v58  ;;  %vm1056_vm5 = vcmp.eq.s32.totalorder %v4112_v13, %v4841_v12  ;;  %v1976_v12 = vld [vmem:[%s5790_s4] sm:$0x77]  ;;  %v1977_v13 = vld [vmem:[%s5790_s4 + $0x8] sm:$0x77]  ;;  %s579_s4 = scalar_lea.vmem %s5793_s2, %s4004_s27  ;;  %s5420_s27 = sand.u32 1, %s5798_s22  }
 0x15c   : > { %v1980_v14 = vcombine.high %v1976_v12, %v1976_v12  ;;  %v1981_v43 = vcombine.high %v1977_v13, %v1977_v13  ;;  %v1982_v44 = vrot.slane %v1976_v12, 1  ;;  %v1984_v47 = vrot.slane %v1977_v13, 1  ;;  %v3593_v1 = vld [vmem:[%s579_s4] ss:$0 sm:$0xff] }
 0x15d   : > { %v2040_v5 = vmul.f32 %v3593_v1, %v2029_v56  ;;  %v2039_v21 = vmul.f32 %v3593_v1, %v2028_v15  ;;  %v2038_v46 = vmul.f32 %v3593_v1, %v2027_v22  ;;  %v2037_v25 = vmul.f32 %v3593_v1, %v2026_v10  ;;  %v2058_v22 = vld [vmem:[%s5797_s5] sm:$0xff]  ;;  %v2063_v10 = vld [vmem:[%s5797_s5 + $0x28] sm:$0xff] }
 0x15e   : > { %3523 = vmatpush2.bf16.msk.msra.mxu0 %vm5788_vm15, %v5712_v58  ;;  %3583 = vmatpush2.bf16.msk.msra.mxu1 %vm5789_vm10, %v5712_v58  ;;  %v1983_v48 = vrot.slane %v1980_v14, 1  ;;  %v1985_v51 = vrot.slane %v1981_v43, 1  ;;  %1990 = vst [vmem:[%s5110_s21 + $0x20] ss:$-28 sps:$4 sm:$0x83] %v1982_v44  }
 0x15f   : > { %3525 = vmatprep.subr.msk.bf16.mxu0 %vm3524_vm12, %v5712_v58  ;;  %3585 = vmatprep.subr.msk.bf16.mxu1 %vm4897_vm6, %v5712_v58  ;;  %vm3588_vm6 = vmpackc.low %vm1060_vm3, %vm1056_vm5  ;;  %1992 = vst [vmem:[%s5110_s21 + $0x30] ss:$-28 sps:$4 sm:$0x83] %v1984_v47  }
 0x160   : > { %1991 = vst [vmem:[%s5110_s21 + $0x28] ss:$-28 sps:$4 sm:$0x83] %v1983_v48   ;;  %1993 = vst [vmem:[%s5110_s21 + $0x38] ss:$-28 sps:$4 sm:$0x83] %v1985_v51  }
 0x162   : > { %3527 = vmatpush2.bf16.msk.msra.mxu0 %vm4901_vm13, %v5712_v58  ;;  %3587 = vmatpush2.bf16.msk.msra.mxu1 %vm4907_vm9, %v5712_v58  ;;  %vm2013_vm13 = vcmask 261120   ;;  %vm2041_vm9 = vcmask 31744  }
 0x163   : > { %3589 = vmatprep.subr.msk.bf16.mxu1 %vm3588_vm6, %v5712_v58  ;;  %v2023_v29 = vsel %vm2013_vm13, %v2012_v2, 0.0  ;;  %v2020_v30 = vsel %vm2013_vm13, %v2011_v8, 0.0  ;;  %v2051_v37 = vsel %vm2041_vm9, %v2040_v5, 0.0  ;;  %v2048_v45 = vsel %vm2041_vm9, %v2039_v21, 0.0 }
 0x164   : > { %2024 = vadd.xlane.f32.xlu0 %v2023_v29  ;;  %2021 = vadd.xlane.f32.xlu1 %v2020_v30  ;;  %v2017_v54 = vsel %vm2013_vm13, %v2010_v38, 0.0  ;;  %v2045_v63 = vsel %vm2041_vm9, %v2038_v46, 0.0  ;;  %v2014_v11 = vsel %vm2013_vm13, %v2009_v62, 0.0  ;;  %v2042_v26 = vsel %vm2041_vm9, %v2037_v25, 0.0  ;;  %v2059_v30 = vld [vmem:[%s5797_s5 + $0x8] sm:$0xff]  ;;  %v2062_v46 = vld [vmem:[%s5797_s5 + $0x20] sm:$0xff] }
 0x165   : > { %1880 = vmatmul.mubr.bf16.vlgmr.msra.gmra.mxu0 %v4836_v57  ;;  %v5159_v57 = vshrl.u32 %v5795_v42, 7  ;;  %v2066_v42 = vld [vmem:[%s5797_s5 + $0x40] sm:$0xff] }
 0x166   : > { %3591 = vmatpush2.bf16.msk.msra.mxu1 %vm3590_vm7, %v5712_v58  ;;  %2164 = vmatprep.mubr.f32.mxu0 %v3859_v52 }
 0x167   : > { %v1950_v50 = vsub.s32 6, %v5159_v57 }
 0x168   : > { %2052 = vadd.xlane.f32.xlu0 %v2051_v37  ;;  %2049 = vadd.xlane.f32.xlu1 %v2048_v45 }
 0x169   : > { %1921 = vmatmul.mubr.bf16.vlgmr.msra.gmra.mxu1 %v4882_v61 }
 0x16a   : > { %2253 = vmatprep.mubr.f32.mxu1 %v3859_v52 }
 0x16c   : > { %2018 = vadd.xlane.f32.xlu0 %v2017_v54  ;;  %2046 = vadd.xlane.f32.xlu1 %v2045_v63 }
 0x170   : > { %2015 = vadd.xlane.f32.xlu0 %v2014_v11 }
 0x174   : > { %2043 = vadd.xlane.f32.xlu0 %v2042_v26 }
 0x1e5   : > { %v1799_v41 = vpop.f32.mrf.mxu0 }
 0x1e7   : > { %v1801_v58 = vpop.f32.mrf.mxu0 }
 0x1e9   : > { %v1803_v18 = vpop.f32.mrf.mxu0  ;;  %v1840_v3 = vpop.f32.mrf.mxu1 }
 0x1ea   : > { %v1841_v17 = vadd.f32 %v1840_v3, %v1799_v41 }
 0x1eb   : > { %v1804_v33 = vpop.f32.mrf.mxu0  ;;  %v1842_v34 = vpop.f32.mrf.mxu1 }
 0x1ec   : > { %v1944_v49 = vmax.f32 %v1841_v17, 1.0  ;;  %v1843_v4 = vadd.f32 %v1842_v34, %v1801_v58  ;;  %v2067_v34 = vld [vmem:[%s5797_s5 + $0x48] sm:$0xff] }
 0x1ed   : > { %v1844_v61 = vpop.f32.mrf.mxu1  ;;  %v5202_v5 = vpop.xlane.xlu0 %2024 }
 0x1ee   : > { %v1951_v0 = vrot.slane %v1944_v49, %v1950_v50  ;;  %v1945_v7 = vmax.f32 %v1843_v4, 1.0  ;;  %v5204_v8 = vpop.xlane.xlu1 %2021 }
 0x1ef   : > { %v1845_v19 = vpop.f32.mrf.mxu1 }
 0x1f0   : > { %3715 = vrcp.f32 %v1951_v0  ;;  %v1955_v6 = vrot.slane %v1945_v7, %v1950_v50  ;;  %v2070_v19 = vld [vmem:[%s5797_s5 + $0x60] sm:$0xff] }
 0x1f1   : > { %v5212_v15 = vpop.xlane.xlu0 %2052 }
 0x1f2   : > { %3717 = vrcp.f32 %v1955_v6  ;;  %v5228_v37 = vpop.xlane.xlu1 %2049 }
 0x1f5   : > { %v5214_v16 = vpop.xlane.xlu0 %2018 }
 0x1f6   : > { %v5245_v58 = vpop.xlane.xlu1 %2046 }
 0x1f9   : > { %v5218_v21 = vpop.xlane.xlu0 %2015 }
 0x1fd   : > { %v3716_v9 = vpop.eup %3715  ;;  %v5233_v53 = vpop.xlane.xlu0 %2043 }
 0x1fe   : > { %v1965_v20 = vmul.f32 %v3716_v9, %v1841_v17 }
 0x1ff   : > { %v3718_v23 = vpop.eup %3717 }
 0x200   : > { %1972 = vst [vmem:[%s5110_s21] sm:$0x7f] %v1965_v20  ;;  %v1967_v24 = vmul.f32 %v3718_v23, %v1843_v4 }
 0x202   : > { %1973 = vst [vmem:[%s5110_s21 + $0x8] sm:$0x7f] %v1967_v24  ;;  %3594 = vmatprep.subr.msk.mxu0 %vm2087_vm0, %v1967_v24 }
 0x203   : > { %3595 = vmatpush1.msk.msra.mxu0 %vm2087_vm0, %v1965_v20 }
 0x204   : > { %3596 = vmatmul.mubr.msk.f32.vlgmr.msra.gmra.mxu0 %vm2074_vm14, %v2054_v27 }
 0x205   : > { %2170 = vmatprep.mubr.f32.mxu0 %v3859_v52 }
 0x208   : > { %3597 = vmatmul.mubr.msk.f32.gmra.mxu0 %vm2074_vm14, %v2055_v28 }
 0x209   : > { %2176 = vmatprep.mubr.f32.mxu0 %v3859_v52 }
 0x20c   : > { %3598 = vmatmul.mubr.msk.f32.gmra.mxu0 %vm2074_vm14, %v2056_v31 }
 0x20d   : > { %2182 = vmatprep.mubr.f32.mxu0 %v3859_v52 }
 0x210   : > { %3599 = vmatmul.mubr.msk.f32.gmra.mxu0 %vm2074_vm14, %v2057_v32 }
 0x211   : > { %2410 = vmatprep.mubr.f32.mxu0 %v3859_v52 }
 0x225   : > { %v1881_v35 = vpop.f32.mrf.mxu0 }
 0x227   : > { %v1883_v36 = vpop.f32.mrf.mxu0 }
 0x229   : > { %v1885_v39 = vpop.f32.mrf.mxu0  ;;  %v1922_v40 = vpop.f32.mrf.mxu1 }
 0x22a   : > { %v1923_v12 = vadd.f32 %v1922_v40, %v1881_v35 }
 0x22b   : > { %v1886_v13 = vpop.f32.mrf.mxu0  ;;  %v1924_v14 = vpop.f32.mrf.mxu1 }
 0x22c   : > { %v1946_v43 = vmax.f32 %v1923_v12, 1.0  ;;  %v1925_v44 = vadd.f32 %v1924_v14, %v1883_v36 }
 0x22d   : > { %v1926_v47 = vpop.f32.mrf.mxu1 }
 0x22e   : > { %v1959_v48 = vrot.slane %v1946_v43, %v1950_v50  ;;  %v1947_v51 = vmax.f32 %v1925_v44, 1.0 }
 0x22f   : > { %v1927_v55 = vpop.f32.mrf.mxu1 }
 0x230   : > { %3719 = vrcp.f32 %v1959_v48  ;;  %v1963_v56 = vrot.slane %v1947_v51, %v1950_v50  ;;  %v5282_v55 = vld [vmem:[%s5543_s9] sm:$0x3] }
 0x232   : > { %3721 = vrcp.f32 %v1963_v56  ;;  %v5290_v56 = vld [vmem:[%s5544_s10] sm:$0xff] }
 0x23d   : > { %v3720_v59 = vpop.eup %3719 }
 0x23e   : > { %v1969_v60 = vmul.f32 %v3720_v59, %v1923_v12  ;;  %v5298_v59 = vld [vmem:[%s5544_s10 + $0x8] sm:$0xff] }
 0x23f   : > { %v3722_v1 = vpop.eup %3721 }
 0x240   : > { %1974 = vst [vmem:[%s5110_s21 + $0x10] sm:$0x7f] %v1969_v60  ;;  %v1971_v2 = vmul.f32 %v3722_v1, %v1925_v44  ;;  %v5314_v1 = vld [vmem:[%s5544_s10 + $0x18] sm:$0xff] }
 0x242   : > { %1975 = vst [vmem:[%s5110_s21 + $0x18] sm:$0x7f] %v1971_v2  ;;  %3600 = vmatprep.subr.msk.mxu1 %vm2087_vm0, %v1971_v2  ;;  %s5199_s21 = sand.u32 1, %s3839_s30   ;;  %v5322_v2 = vld [vmem:[%s5544_s10 + $0x20] sm:$0xff] }
 0x243   : > { %3601 = vmatpush1.msk.msra.mxu1 %vm2087_vm0, %v1969_v60  ;;  %s3636_s17 = smul.u32 88, %s5199_s21  ;;  %s3073_s20 = sshll.u32 %s5199_s21, 7  ;;  %v5306_v60 = vld [vmem:[%s5544_s10 + $0x10] sm:$0xff] }
 0x244   : > { %3602 = vmatmul.mubr.msk.f32.vlgmr.msra.gmra.mxu1 %vm2074_vm14, %v2054_v27  ;;  %s5253_s26 = scalar_lea.vmem [#allocation5], %s3073_s20  ;;  %v2071_v27 = vld [vmem:[%s5797_s5 + $0x68] sm:$0xff]  ;;  %s3072_s24 = sshll.u32 %s5199_s21, 3 }
 0x245   : > { %2259 = vmatprep.mubr.f32.mxu1 %v3859_v52  ;;  %s5206_s4 = scalar_lea.vmem [#allocation7], %s3636_s17  ;;  %s5415_s20 = scalar_lea.vmem [#allocation3], %s3072_s24 }
 0x246   : > { %2806 = vst [vmem:[%s5206_s4 + $0x50] sm:$0xff] %v5202_v5  ;;  %2805 = vst [vmem:[%s5206_s4 + $0x48] sm:$0xff] %v5204_v8  ;;  %s2853_s0 = sshll.u32 %s5253_s26, 4  ;;  %s3861_s24 = smov [#allocation5]   ;;  %s5429_s0 = int_to_ptr.vmem [resolvable:$true] %s2853_s0 }
 0x247   : > { %2804 = vst [vmem:[%s5206_s4 + $0x40] sm:$0xff] %v5214_v16  ;;  %2803 = vst [vmem:[%s5206_s4 + $0x38] sm:$0xff] %v5218_v21  ;;  %s3723_s28 = scalar_lea.vmem %s5429_s0, 2048  ;;  %s3727_s22 = sshll.u32 %s3861_s24, 4  ;;  %s3728_s22 = int_to_ptr.vmem [resolvable:$false] %s3727_s22 }
 0x248   : > { %3603 = vmatmul.mubr.msk.f32.gmra.mxu1 %vm2074_vm14, %v2055_v28  ;;  %p3724_p12 = scmp.ne.s32.totalorder %s5429_s0, %s3723_s28  ;;  %s3729_s2 = scalar_lea.vmem %s3728_s22, 4096 }
 0x249   : > { %2265 = vmatprep.mubr.f32.mxu1 %v3859_v52  ;;  %p3730_p1 = scmp.lt.s32.totalorder %s5429_s0, %s3728_s22  ;;  %p3731_p2 = scmp.lt.s32.totalorder %s3729_s2, %s3723_s28 }
 0x24a   : > { %p3725_p13 = pnand %p3724_p12, %p3985_p4 }
 0x24b   : > { %p3732_p3 = por %p3731_p2, %p3730_p1 }
 0x24c   : > { %3604 = vmatmul.mubr.msk.f32.gmra.mxu1 %vm2074_vm14, %v2056_v31  ;;  %p3726_p0 = pneg %p3725_p13 }
 0x24d   : > { %2271 = vmatprep.mubr.f32.mxu1 %v3859_v52 }
 0x24e   : > { %p3733_p5 = pnand %p3732_p3, %p3726_p0 }
 0x250   : > { %3605 = vmatmul.mubr.msk.f32.gmra.mxu1 %vm2074_vm14, %v2057_v32 }
 0x251   : > { %2481 = vmatprep.mubr.f32.mxu1 %v3859_v52 }
 0x2c4   : > { %v2166_v29 = vpop.f32.mrf.mxu0 }
 0x2c5   : > { %v2167_v38 = vadd.f32 %v2166_v29, %v2058_v22  ;;  %v5330_v22 = vld [vmem:[%s5544_s10 + $0x28] sm:$0xff]  ;;  %v5338_v29 = vld [vmem:[%s5544_s10 + $0x30] sm:$0xff] }
 0x2c6   : > { %v2168_v45 = vpop.f32.mrf.mxu0 }
 0x2c7   : > { %v2169_v54 = vadd.f32 %v2168_v45, %v2059_v30  ;;  %v2278_v62 = vadd.f32 %v2167_v38, %v5218_v21  ;;  %v2060_v30 = vld [vmem:[%s5797_s5 + $0x10] sm:$0xff]  ;;  %v2061_v45 = vld [vmem:[%s5797_s5 + $0x18] sm:$0xff] }
 0x2c8   : > { %v2172_v63 = vpop.f32.mrf.mxu0 }
 0x2c9   : > { %v2173_v11 = vadd.f32 %v2172_v63, %v2062_v46  ;;  %v2294_v25 = vadd.f32 %v2278_v62, %v5233_v53  ;;  %v2279_v26 = vadd.f32 %v2169_v54, %v5218_v21  ;;  %v2064_v62 = vld [vmem:[%s5797_s5 + $0x30] sm:$0xff] }
 0x2ca   : > { %v2174_v41 = vpop.f32.mrf.mxu0 }
 0x2cb   : > { %v2175_v18 = vadd.f32 %v2174_v41, %v2063_v10  ;;  %v2282_v3 = vadd.f32 %v2173_v11, %v5214_v16  ;;  %v2310_v17 = vmax.f32 %v2294_v25, 0.0  ;;  %v2295_v50 = vadd.f32 %v2279_v26, %v5233_v53  ;;  %v2065_v25 = vld [vmem:[%s5797_s5 + $0x38] sm:$0xff] }
 0x2cc   : > { %v2178_v33 = vpop.f32.mrf.mxu0 }
 0x2cd   : > { %v2179_v49 = vadd.f32 %v2178_v33, %v2066_v42  ;;  %v2298_v4 = vadd.f32 %v2282_v3, %v5245_v58  ;;  %2326 = vst [vmem:[%s5253_s26] sm:$0xff] %v2310_v17  ;;  %v2283_v61 = vadd.f32 %v2175_v18, %v5214_v16  ;;  %v2311_v0 = vmax.f32 %v2295_v50, 0.0  ;;  %v2068_v3 = vld [vmem:[%s5797_s5 + $0x50] sm:$0xff] }
 0x2ce   : > { %v2180_v7 = vpop.f32.mrf.mxu0 }
 0x2cf   : > { %v2181_v6 = vadd.f32 %v2180_v7, %v2067_v34  ;;  %v2286_v9 = vadd.f32 %v2179_v49, %v5204_v8  ;;  %v2314_v20 = vmax.f32 %v2298_v4, 0.0  ;;  %v2299_v23 = vadd.f32 %v2283_v61, %v5245_v58  ;;  %2327 = vst [vmem:[%s5253_s26 + $0x8] sm:$0xff] %v2311_v0  ;;  %v2069_v4 = vld [vmem:[%s5797_s5 + $0x58] sm:$0xff] }
 0x2d0   : > { %v2184_v24 = vpop.f32.mrf.mxu0 }
 0x2d1   : > { %v2185_v28 = vadd.f32 %v2184_v24, %v2070_v19  ;;  %v2302_v31 = vadd.f32 %v2286_v9, %v5228_v37  ;;  %2330 = vst [vmem:[%s5253_s26 + $0x20] sm:$0xff] %v2314_v20  ;;  %v2287_v32 = vadd.f32 %v2181_v6, %v5204_v8  ;;  %v2315_v35 = vmax.f32 %v2299_v23, 0.0  ;;  %v2072_v6 = vld [vmem:[%s5797_s5 + $0x70] sm:$0xff] }
 0x2d2   : > { %v2186_v36 = vpop.f32.mrf.mxu0 }
 0x2d3   : > { %v2290_v39 = vadd.f32 %v2185_v28, %v5202_v5  ;;  %v2187_v40 = vadd.f32 %v2186_v36, %v2071_v27  ;;  %v2318_v12 = vmax.f32 %v2302_v31, 0.0  ;;  %v2303_v13 = vadd.f32 %v2287_v32, %v5228_v37  ;;  %2331 = vst [vmem:[%s5253_s26 + $0x28] sm:$0xff] %v2315_v35 }
 0x2d5   : > { %v2306_v14 = vadd.f32 %v2290_v39, %v5212_v15  ;;  %v2291_v43 = vadd.f32 %v2187_v40, %v5202_v5  ;;  %2334 = vst [vmem:[%s5253_s26 + $0x40] sm:$0xff] %v2318_v12  ;;  %v2319_v44 = vmax.f32 %v2303_v13, 0.0 }
 0x2d7   : > { %v2322_v47 = vmax.f32 %v2306_v14, 0.0  ;;  %v2307_v48 = vadd.f32 %v2291_v43, %v5212_v15  ;;  %2335 = vst [vmem:[%s5253_s26 + $0x48] sm:$0xff] %v2319_v44 }
 0x2d9   : > { %2338 = vst [vmem:[%s5253_s26 + $0x60] sm:$0xff] %v2322_v47  ;;  %v2323_v51 = vmax.f32 %v2307_v48, 0.0 }
 0x2db   : > { %2339 = vst [vmem:[%s5253_s26 + $0x68] sm:$0xff] %v2323_v51  ;;  %2370 = vmatprep.subr.mxu0 %v2323_v51 }
 0x2dc   : > { %2371 = vmatpush1.msra.mxu0 %v2322_v47 }
 0x2dd   : > { %2372 = vmatprep.subr.mxu0 %v2319_v44 }
 0x2de   : > { %2373 = vmatpush1.msra.mxu0 %v2318_v12 }
 0x2df   : > { %2374 = vmatprep.subr.mxu0 %v2315_v35 }
 0x2e0   : > { %2375 = vmatpush1.msra.mxu0 %v2314_v20 }
 0x2e1   : > { %2376 = vmatprep.subr.mxu0 %v2311_v0 }
 0x2e2   : > { %2377 = vmatpush1.msra.mxu0 %v2310_v17 }
 0x2e3   : > { %2563 = vmatprep.subr.mxu0 %v2323_v51  ;;  %3606 = vmatmul.mubr.msk.f32.vlgmr.msra.gmra.mxu0 %vm2013_vm13, %v5282_v55 }
 0x2e4   : > { %2564 = vmatpush1.msra.mxu0 %v2322_v47  ;;  %2603 = vmatprep.mubr.f32.mxu0 %v3859_v52 }
 0x2e5   : > { %2565 = vmatprep.subr.mxu0 %v2319_v44 }
 0x2e6   : > { %2566 = vmatpush1.msra.mxu0 %v2318_v12 }
 0x2e7   : > { %2567 = vmatprep.subr.mxu0 %v2315_v35 }
 0x2e8   : > { %2568 = vmatpush1.msra.mxu0 %v2314_v20 }
 0x2e9   : > { %2569 = vmatprep.subr.mxu0 %v2311_v0 }
 0x2ea   : > { %2570 = vmatpush1.msra.mxu0 %v2310_v17 }
 0x2eb   : > { %3608 = vmatmul.mubr.msk.f32.vlgmr.msra.gmra.mxu0 %vm2013_vm13, %v5290_v56 }
 0x2ec   : > { %2609 = vmatprep.mubr.f32.mxu0 %v3859_v52 }
 0x2ef   : > { %3609 = vmatmul.mubr.msk.f32.gmra.mxu0 %vm2013_vm13, %v5298_v59 }
 0x2f0   : > { %2615 = vmatprep.mubr.f32.mxu0 %v3859_v52 }
 0x2f3   : > { %3610 = vmatmul.mubr.msk.f32.gmra.mxu0 %vm2013_vm13, %v5306_v60 }
 0x2f4   : > { %2621 = vmatprep.mubr.f32.mxu0 %v3859_v52 }
 0x2f7   : > { %3611 = vmatmul.mubr.msk.f32.gmra.mxu0 %vm2013_vm13, %v5314_v1 }
 0x2f8   : > { %2627 = vmatprep.mubr.f32.mxu0 %v3859_v52 }
 0x2fb   : > { %3612 = vmatmul.mubr.msk.f32.gmra.mxu0 %vm2013_vm13, %v5322_v2 }
 0x2fc   : > { %2633 = vmatprep.mubr.f32.mxu0 %v3859_v52 }
 0x2ff   : > { %3613 = vmatmul.mubr.msk.f32.gmra.mxu0 %vm2013_vm13, %v5330_v22 }
 0x300   : > { %2639 = vmatprep.mubr.f32.mxu0 %v3859_v52 }
 0x303   : > { %3614 = vmatmul.mubr.msk.f32.gmra.mxu0 %vm2013_vm13, %v5338_v29 }
 0x304   : > { %v2255_v38 = vpop.f32.mrf.mxu1 }
 0x305   : > { %v2256_v46 = vadd.f32 %v2255_v38, %v2060_v30 }
 0x306   : > { %v2257_v54 = vpop.f32.mrf.mxu1 }
 0x307   : > { %v2280_v63 = vadd.f32 %v2256_v46, %v5218_v21  ;;  %v2258_v10 = vadd.f32 %v2257_v54, %v2061_v45 }
 0x308   : > { %v2261_v11 = vpop.f32.mrf.mxu1 }
 0x309   : > { %v2296_v26 = vadd.f32 %v2280_v63, %v5233_v53  ;;  %v2281_v41 = vadd.f32 %v2258_v10, %v5218_v21  ;;  %v2262_v42 = vadd.f32 %v2261_v11, %v2064_v62 }
 0x30a   : > { %v2263_v18 = vpop.f32.mrf.mxu1 }
 0x30b   : > { %v2312_v17 = vmax.f32 %v2296_v26, 0.0  ;;  %v2284_v50 = vadd.f32 %v2262_v42, %v5214_v16  ;;  %v2264_v33 = vadd.f32 %v2263_v18, %v2065_v25  ;;  %v2297_v34 = vadd.f32 %v2281_v41, %v5233_v53 }
 0x30c   : > { %v2267_v49 = vpop.f32.mrf.mxu1 }
 0x30d   : > { %2328 = vst [vmem:[%s5253_s26 + $0x10] sm:$0xff] %v2312_v17  ;;  %v2300_v21 = vadd.f32 %v2284_v50, %v5245_v58  ;;  %v2285_v61 = vadd.f32 %v2264_v33, %v5214_v16  ;;  %v2268_v0 = vadd.f32 %v2267_v49, %v2068_v3  ;;  %v2313_v7 = vmax.f32 %v2297_v34, 0.0  ;;  %v2073_v16 = vld [vmem:[%s5797_s5 + $0x78] sm:$0xff] }
 0x30e   : > { %v2269_v19 = vpop.f32.mrf.mxu1 }
 0x30f   : > { %v2316_v9 = vmax.f32 %v2300_v21, 0.0  ;;  %v2288_v53 = vadd.f32 %v2268_v0, %v5204_v8  ;;  %v2270_v20 = vadd.f32 %v2269_v19, %v2069_v4  ;;  %v2301_v23 = vadd.f32 %v2285_v61, %v5245_v58  ;;  %2329 = vst [vmem:[%s5253_s26 + $0x18] sm:$0xff] %v2313_v7 }
 0x310   : > { %v2273_v24 = vpop.f32.mrf.mxu1 }
 0x311   : > { %2332 = vst [vmem:[%s5253_s26 + $0x30] sm:$0xff] %v2316_v9  ;;  %v2304_v27 = vadd.f32 %v2288_v53, %v5228_v37  ;;  %v2289_v28 = vadd.f32 %v2270_v20, %v5204_v8  ;;  %v2274_v31 = vadd.f32 %v2273_v24, %v2072_v6  ;;  %v2317_v32 = vmax.f32 %v2301_v23, 0.0 }
 0x312   : > { %v2275_v35 = vpop.f32.mrf.mxu1 }
 0x313   : > { %v2320_v36 = vmax.f32 %v2304_v27, 0.0  ;;  %v2292_v58 = vadd.f32 %v2274_v31, %v5202_v5  ;;  %v2276_v39 = vadd.f32 %v2275_v35, %v2073_v16  ;;  %v2305_v40 = vadd.f32 %v2289_v28, %v5228_v37  ;;  %2333 = vst [vmem:[%s5253_s26 + $0x38] sm:$0xff] %v2317_v32 }
 0x315   : > { %2336 = vst [vmem:[%s5253_s26 + $0x50] sm:$0xff] %v2320_v36  ;;  %v2308_v12 = vadd.f32 %v2292_v58, %v5212_v15  ;;  %v2293_v13 = vadd.f32 %v2276_v39, %v5202_v5  ;;  %v2321_v14 = vmax.f32 %v2305_v40, 0.0 }
 0x317   : > { %v2324_v43 = vmax.f32 %v2308_v12, 0.0  ;;  %v2309_v8 = vadd.f32 %v2293_v13, %v5212_v15  ;;  %2337 = vst [vmem:[%s5253_s26 + $0x58] sm:$0xff] %v2321_v14 }
 0x319   : > { %2340 = vst [vmem:[%s5253_s26 + $0x70] sm:$0xff] %v2324_v43  ;;  %v2325_v44 = vmax.f32 %v2309_v8, 0.0 }
 0x31b   : > { %2341 = vst [vmem:[%s5253_s26 + $0x78] sm:$0xff] %v2325_v44  ;;  %2441 = vmatprep.subr.mxu1 %v2325_v44 }
 0x31c   : > { %2442 = vmatpush1.msra.mxu1 %v2324_v43 }
 0x31d   : > { %2443 = vmatprep.subr.mxu1 %v2321_v14 }
 0x31e   : > { %2444 = vmatpush1.msra.mxu1 %v2320_v36 }
 0x31f   : > { %2445 = vmatprep.subr.mxu1 %v2317_v32 }
 0x320   : > { %2446 = vmatpush1.msra.mxu1 %v2316_v9 }
 0x321   : > { %2447 = vmatprep.subr.mxu1 %v2313_v7 }
 0x322   : > { %2448 = vmatpush1.msra.mxu1 %v2312_v17 }
 0x323   : > { %2670 = vmatprep.subr.mxu1 %v2325_v44  ;;  %3607 = vmatmul.mubr.msk.f32.vlgmr.msra.gmra.mxu1 %vm2013_vm13, %v5282_v55 }
 0x324   : > { %2671 = vmatpush1.msra.mxu1 %v2324_v43  ;;  %2710 = vmatprep.mubr.f32.mxu1 %v3859_v52 }
 0x325   : > { %2672 = vmatprep.subr.mxu1 %v2321_v14 }
 0x326   : > { %2673 = vmatpush1.msra.mxu1 %v2320_v36 }
 0x327   : > { %2674 = vmatprep.subr.mxu1 %v2317_v32 }
 0x328   : > { %2675 = vmatpush1.msra.mxu1 %v2316_v9 }
 0x329   : > { %2676 = vmatprep.subr.mxu1 %v2313_v7 }
 0x32a   : > { %2677 = vmatpush1.msra.mxu1 %v2312_v17 }
 0x32b   : > { %3615 = vmatmul.mubr.msk.f32.vlgmr.msra.gmra.mxu1 %vm2013_vm13, %v5290_v56  ;;  %v3860_v56 = vmov 1983009808  }
 0x32c   : > { %2716 = vmatprep.mubr.f32.mxu1 %v3859_v52 }
 0x32f   : > { %3616 = vmatmul.mubr.msk.f32.gmra.mxu1 %vm2013_vm13, %v5298_v59  ;;  %v2495_v59 = vunpack.c.l.s4 %v3860_v56 }
 0x330   : > { %2722 = vmatprep.mubr.f32.mxu1 %v3859_v52 }
 0x333   : > { %3617 = vmatmul.mubr.msk.f32.gmra.mxu1 %vm2013_vm13, %v5306_v60 }
 0x334   : > { %2728 = vmatprep.mubr.f32.mxu1 %v3859_v52 }
 0x337   : > { %3618 = vmatmul.mubr.msk.f32.gmra.mxu1 %vm2013_vm13, %v5314_v1  ;;  %v2496_v1 = vunpack.c.0.s8 %v2495_v59 }
 0x338   : > { %2734 = vmatprep.mubr.f32.mxu1 %v3859_v52 }
 0x33b   : > { %3619 = vmatmul.mubr.msk.f32.gmra.mxu1 %vm2013_vm13, %v5322_v2 }
 0x33c   : > { %2740 = vmatprep.mubr.f32.mxu1 %v3859_v52 }
 0x33f   : > { %3620 = vmatmul.mubr.msk.f32.gmra.mxu1 %vm2013_vm13, %v5330_v22 }
 0x340   : > { %2746 = vmatprep.mubr.f32.mxu1 %v3859_v52  ;;  %v2499_v52 = vsub.s32 %v2496_v1, %v5159_v57 }
 0x343   : > { %3621 = vmatmul.mubr.msk.f32.gmra.mxu1 %vm2013_vm13, %v5338_v29 }
 0x3a3   : > { %v2412_v5 = vpop.f32.mrf.mxu0 }
 0x3a5   : > { %v2414_v15 = vpop.f32.mrf.mxu0 }
 0x3a6   : > { %v2492_v22 = vcombine.low %v2412_v5, %v2414_v15 }
 0x3a8   : > { %v2500_v46 = vrot.slane %v2492_v22, %v2499_v52 }
 0x3ab   : > { %v2605_v37 = vpop.f32.mrf.mxu0 }
 0x3ad   : > { %v2607_v47 = vpop.f32.mrf.mxu0 }
 0x3ae   : > { %v2753_v63 = vadd.f32 %v2607_v47, %v2605_v37 }
 0x3af   : > { %v2611_v48 = vpop.f32.mrf.mxu0 }
 0x3b1   : > { %v2613_v51 = vpop.f32.mrf.mxu0 }
 0x3b2   : > { %v2758_v41 = vadd.f32 %v2613_v51, %v2611_v48 }
 0x3b3   : > { %v2617_v55 = vpop.f32.mrf.mxu0 }
 0x3b5   : > { %v2619_v60 = vpop.f32.mrf.mxu0 }
 0x3b6   : > { %v2763_v50 = vadd.f32 %v2619_v60, %v2617_v55 }
 0x3b7   : > { %v2623_v30 = vpop.f32.mrf.mxu0 }
 0x3b9   : > { %v2625_v29 = vpop.f32.mrf.mxu0 }
 0x3ba   : > { %v2768_v61 = vadd.f32 %v2625_v29, %v2623_v30 }
 0x3bb   : > { %v2629_v11 = vpop.f32.mrf.mxu0 }
 0x3bd   : > { %v2631_v57 = vpop.f32.mrf.mxu0 }
 0x3be   : > { %v2773_v53 = vadd.f32 %v2631_v57, %v2629_v11 }
 0x3bf   : > { %v2635_v49 = vpop.f32.mrf.mxu0 }
 0x3c1   : > { %v2637_v19 = vpop.f32.mrf.mxu0 }
 0x3c2   : > { %v2778_v28 = vadd.f32 %v2637_v19, %v2635_v49 }
 0x3c3   : > { %v2641_v24 = vpop.f32.mrf.mxu0 }
 0x3c5   : > { %v2643_v35 = vpop.f32.mrf.mxu0 }
 0x3c6   : > { %v2783_v39 = vadd.f32 %v2643_v35, %v2641_v24 }
 0x3e3   : > { %v2483_v2 = vpop.f32.mrf.mxu1 }
 0x3e5   : > { %v2485_v38 = vpop.f32.mrf.mxu1 }
 0x3e6   : > { %v2493_v45 = vcombine.low %v2483_v2, %v2485_v38 }
 0x3e8   : > { %v2507_v54 = vrot.slane %v2493_v45, %v2499_v52 }
 0x3ea   : > { %v2508_v62 = vcombine.low %v2500_v46, %v2507_v54 }
 0x3eb   : > { %v2712_v10 = vpop.f32.mrf.mxu1 }
 0x3ec   : > { %v2754_v25 = vadd.f32 %v2753_v63, %v2712_v10  ;;  %2510 = vst [vmem:[%s5415_s20] sm:$0xff] %v2508_v62 }
 0x3ed   : > { %v2714_v26 = vpop.f32.mrf.mxu1 }
 0x3ee   : > { %v2755_v42 = vadd.f32 %v2754_v25, %v2714_v26 }
 0x3ef   : > { %v2718_v18 = vpop.f32.mrf.mxu1 }
 0x3f0   : > { %v2759_v3 = vadd.f32 %v2758_v41, %v2718_v18  ;;  %2756 = vadd.xlane.f32.xlu1 %v2755_v42 }
 0x3f1   : > { %v2720_v17 = vpop.f32.mrf.mxu1 }
 0x3f2   : > { %v2760_v33 = vadd.f32 %v2759_v3, %v2720_v17 }
 0x3f3   : > { %v2724_v34 = vpop.f32.mrf.mxu1 }
 0x3f4   : > { %v2764_v4 = vadd.f32 %v2763_v50, %v2724_v34  ;;  %2761 = vadd.xlane.f32.xlu0 %v2760_v33 }
 0x3f5   : > { %v2726_v21 = vpop.f32.mrf.mxu1 }
 0x3f6   : > { %v2765_v0 = vadd.f32 %v2764_v4, %v2726_v21 }
 0x3f7   : > { %v2730_v7 = vpop.f32.mrf.mxu1 }
 0x3f8   : > { %v2769_v6 = vadd.f32 %v2768_v61, %v2730_v7  ;;  %2766 = vadd.xlane.f32.xlu1 %v2765_v0 }
 0x3f9   : > { %v2732_v9 = vpop.f32.mrf.mxu1 }
 0x3fa   : > { %v2770_v20 = vadd.f32 %v2769_v6, %v2732_v9 }
 0x3fb   : > { %v2736_v23 = vpop.f32.mrf.mxu1 }
 0x3fc   : > { %v2774_v16 = vadd.f32 %v2773_v53, %v2736_v23  ;;  %2771 = vadd.xlane.f32.xlu0 %v2770_v20 }
 0x3fd   : > { %v2738_v27 = vpop.f32.mrf.mxu1 }
 0x3fe   : > { %v2775_v31 = vadd.f32 %v2774_v16, %v2738_v27 }
 0x3ff   : > { %v2742_v32 = vpop.f32.mrf.mxu1 }
 0x400   : > { %v2779_v36 = vadd.f32 %v2778_v28, %v2742_v32  ;;  %2776 = vadd.xlane.f32.xlu1 %v2775_v31 }
 0x401   : > { %v2744_v58 = vpop.f32.mrf.mxu1 }
 0x402   : > { %v2780_v40 = vadd.f32 %v2779_v36, %v2744_v58 }
 0x403   : > { %v2748_v12 = vpop.f32.mrf.mxu1 }
 0x404   : > { %v2784_v13 = vadd.f32 %v2783_v39, %v2748_v12  ;;  %2781 = vadd.xlane.f32.xlu0 %v2780_v40 }
 0x405   : > { %v2750_v14 = vpop.f32.mrf.mxu1 }
 0x406   : > { %v2785_v43 = vadd.f32 %v2784_v13, %v2750_v14 }
 0x408   : > { %2786 = vadd.xlane.f32.xlu1 %v2785_v43 }
 0x409   : > { %3736 = shalt.err (!%p3733_p5)
}
 0x40a   : > { %s3737_s26 = scalar_lea.hbm %s5426_s15, 2048  ;;  %s3741_s17 = scalar_lea.hbm %s5547_s13, 4096 }
 0x40b   : > { %p3738_p6 = scmp.ne.s32.totalorder %s5426_s15, %s3737_s26  ;;  %p3742_p10 = scmp.lt.s32.totalorder %s5426_s15, %s5547_s13 }
 0x40c   : > { %p3743_p11 = scmp.lt.s32.totalorder %s3741_s17, %s3737_s26 }
 0x40d   : > { %p3739_p7 = pnand %p3738_p6, %p3985_p4 }
 0x40e   : > { %p3744_p12 = por %p3743_p11, %p3742_p10 }
 0x40f   : > { %p3740_p9 = pneg %p3739_p7 }
 0x411   : > { %p3745_p13 = pnand %p3744_p12, %p3740_p9 }
 0x413   : > { %3748 = shalt.err (!%p3745_p13)
}
 0x414   : > { %s3862_s2 = smov 512   ;;  %s3863_s28 = smov 32  }
 0x415   : > { %s5799_s22 = scalar_lea.sflag [#allocation6], %s5420_s27  ;;  %s3634_s1 = sshll.u32 %s3847_s16, 7 }
 0x416   : > { %3639 = dma.vmem_to_hbm [thread:$0]  (%p3985_p4), %s5429_s0, 2048, %s5426_s15, %s5799_s22, %s3862_s2, %s3862_s2, %s3863_s28  }
 0x417   : > { %s2838_s26 = scalar_lea.hbm %s5546_s12, %s3634_s1  ;;  %s2840_s17 = sshll.u32 %s5415_s20, 4  ;;  %s2841_s17 = int_to_ptr.vmem [resolvable:$true] %s2840_s17 }
 0x418   : > { %s2813_s24 = scalar_lea.sflag [#allocation4], %s5199_s21  ;;  %s3749_s3 = scalar_lea.vmem %s2841_s17, 128 }
 0x419   : > { %p3750_p0 = scmp.ne.s32.totalorder %s2841_s17, %s3749_s3  ;;  %s3864_s5 = smov [#allocation3]  }
 0x41a   : > { %s3753_s6 = sshll.u32 %s3864_s5, 4  ;;  %s3754_s6 = int_to_ptr.vmem [resolvable:$false] %s3753_s6 }
 0x41b   : > { %p3751_p1 = pnand %p3750_p0, %p3985_p4  ;;  %s3755_s7 = scalar_lea.vmem %s3754_s6, 256 }
 0x41c   : > { %p3756_p3 = scmp.lt.s32.totalorder %s2841_s17, %s3754_s6  ;;  %p3757_p5 = scmp.lt.s32.totalorder %s3755_s7, %s3749_s3 }
 0x41d   : > { %p3752_p2 = pneg %p3751_p1 }
 0x41e   : > { %p3758_p6 = por %p3757_p5, %p3756_p3 }
 0x420   : > { %p3759_p7 = pnand %p3758_p6, %p3752_p2 }
 0x422   : > { %3762 = shalt.err (!%p3759_p7)
}
 0x423   : > { %s3763_s15 = scalar_lea.hbm %s2838_s26, 128  ;;  %s3767_s0 = scalar_lea.hbm %s5546_s12, 256 }
 0x424   : > { %p3764_p9 = scmp.ne.s32.totalorder %s2838_s26, %s3763_s15  ;;  %p3768_p12 = scmp.lt.s32.totalorder %s2838_s26, %s5546_s12 }
 0x425   : > { %p3769_p13 = scmp.lt.s32.totalorder %s3767_s0, %s3763_s15 }
 0x426   : > { %p3765_p10 = pnand %p3764_p9, %p3985_p4 }
 0x427   : > { %p3770_p0 = por %p3769_p13, %p3768_p12 }
 0x428   : > { %p3766_p11 = pneg %p3765_p10 }
 0x42a   : > { %p3771_p1 = pnand %p3770_p0, %p3766_p11 }
 0x42c   : > { %3774 = shalt.err (!%p3771_p1)
}
 0x42d   : > { %3638 = dma.vmem_to_hbm [thread:$0]  (%p3985_p4), %s2841_s17, 128, %s2838_s26, %s2813_s24  }
 0x42e   : > { %s3637_s3 = smul.u32 1408, %s3847_s16  ;;  %s2869_s5 = sshll.u32 %s5206_s4, 4  ;;  %s5485_s5 = int_to_ptr.vmem [resolvable:$true] %s2869_s5 }
 0x42f   : > { %s3775_s1 = scalar_lea.vmem %s5485_s5, 1408  ;;  %s3865_s16 = smov [#allocation7]  }
 0x430   : > { %s5483_s22 = scalar_lea.hbm %s5548_s14, %s3637_s3  ;;  %p3776_p2 = scmp.ne.s32.totalorder %s5485_s5, %s3775_s1 }
 0x431   : > { %s3779_s19 = sshll.u32 %s3865_s16, 4  ;;  %s3780_s19 = int_to_ptr.vmem [resolvable:$false] %s3779_s19 }
 0x432   : > { %p3777_p3 = pnand %p3776_p2, %p3985_p4  ;;  %s3781_s11 = scalar_lea.vmem %s3780_s19, 2816 }
 0x433   : > { %p3782_p6 = scmp.lt.s32.totalorder %s5485_s5, %s3780_s19  ;;  %p3783_p7 = scmp.lt.s32.totalorder %s3781_s11, %s3775_s1 }
 0x434   : > { %p3778_p5 = pneg %p3777_p3 }
 0x435   : > { %p3784_p9 = por %p3783_p7, %p3782_p6 }
 0x437   : > { %p3785_p10 = pnand %p3784_p9, %p3778_p5 }
 0x479   : > { %v2757_v8 = vpop.xlane.xlu1 %2756 }
 0x47a   : > { %v2789_v44 = vmul.f32 0.001953125, %v2757_v8 }
 0x47c   : > { %2796 = vst [vmem:[%s5206_s4] sm:$0xff] %v2789_v44 }
 0x47d   : > { %v2762_v5 = vpop.xlane.xlu0 %2761 }
 0x47e   : > { %v2790_v15 = vmul.f32 0.001953125, %v2762_v5 }
 0x480   : > { %2797 = vst [vmem:[%s5206_s4 + $0x8] sm:$0xff] %v2790_v15 }
 0x481   : > { %v2767_v37 = vpop.xlane.xlu1 %2766 }
 0x482   : > { %v2791_v47 = vmul.f32 0.001953125, %v2767_v37 }
 0x484   : > { %2798 = vst [vmem:[%s5206_s4 + $0x10] sm:$0xff] %v2791_v47 }
 0x485   : > { %v2772_v48 = vpop.xlane.xlu0 %2771 }
 0x486   : > { %v2792_v51 = vmul.f32 0.001953125, %v2772_v48 }
 0x488   : > { %2799 = vst [vmem:[%s5206_s4 + $0x18] sm:$0xff] %v2792_v51 }
 0x489   : > { %v2777_v55 = vpop.xlane.xlu1 %2776 }
 0x48a   : > { %v2793_v56 = vmul.f32 0.001953125, %v2777_v55 }
 0x48c   : > { %2800 = vst [vmem:[%s5206_s4 + $0x20] sm:$0xff] %v2793_v56 }
 0x48d   : > { %v2782_v59 = vpop.xlane.xlu0 %2781 }
 0x48e   : > { %v2794_v60 = vmul.f32 0.001953125, %v2782_v59 }
 0x490   : > { %2801 = vst [vmem:[%s5206_s4 + $0x28] sm:$0xff] %v2794_v60 }
 0x491   : > { %v2787_v1 = vpop.xlane.xlu1 %2786 }
 0x492   : > { %v2795_v2 = vmul.f32 0.001953125, %v2787_v1 }
 0x494   : > { %2802 = vst [vmem:[%s5206_s4 + $0x30] sm:$0xff] %v2795_v2 }
 0x495   : > { %3788 = shalt.err (!%p3785_p10)
}
 0x496   : > { %s3789_s26 = scalar_lea.hbm %s5483_s22, 1408  ;;  %s3793_s24 = scalar_lea.hbm %s5548_s14, 2816 }
 0x497   : > { %p3790_p11 = scmp.ne.s32.totalorder %s5483_s22, %s3789_s26  ;;  %p3794_p0 = scmp.lt.s32.totalorder %s5483_s22, %s5548_s14 }
 0x498   : > { %p3795_p1 = scmp.lt.s32.totalorder %s3793_s24, %s3789_s26 }
 0x499   : > { %p3791_p12 = pnand %p3790_p11, %p3985_p4 }
 0x49a   : > { %p3796_p2 = por %p3795_p1, %p3794_p0 }
 0x49b   : > { %p3792_p13 = pneg %p3791_p12 }
 0x49d   : > { %p3797_p3 = pnand %p3796_p2, %p3792_p13 }
 0x49f   : > { %3800 = shalt.err (!%p3797_p3)
}
 0x4a0   : > { %s3866_s20 = smov 128   ;;  %s3867_s0 = smov 8  }
 0x4a1   : > { %s5800_s2 = scalar_lea.sflag [#allocation6], %s5420_s27 }
 0x4a2   : > { %3640 = dma.vmem_to_hbm [thread:$0]  (%p3985_p4), %s5485_s5, 1408, %s5483_s22, %s5800_s2, %s3866_s20, %s3866_s20, %s3867_s0  }
 0x4a3 PF: > { %p3654_p5 = scmp.ge.s32.totalorder %s3855_s18, 2  ;;  %s2892_s28 = sand.u32 1, %s3835_s29  }
 0x4a4   : > { %s2893_s3 = scalar_lea.sflag [#allocation4], %s2892_s28 }
 0x4a5   : > { %p3645_p6 = pnand %p3654_p5, %p3994_p8 }
 0x4a7   : > { %p3646_p7 = pneg %p3645_p6 }
 0x4a9   : > { %3826 = dma.done.wait (%p3646_p7), %s2893_s3, 128  }
 0x4aa   : > { %3828 = vsyncadd (%p3646_p7), %s2893_s3, 4294967168  ;;  %s5801_s6 = sadd.s32 4294967294, %s3855_s18  }
 0x4ab   : > { %s2901_s7 = sand.u32 1, %s5801_s6  }
 0x4ac   : > { %s2902_s1 = scalar_lea.sflag [#allocation6], %s2901_s7 }
 0x4ad   : > { %3830 = dma.done.wait (%p3646_p7), %s2902_s1, 3456  }
 0x4ae   : > { %3832 = vsyncadd (%p3646_p7), %s2902_s1, 4294963840  ;;  %s31_s18 = sadd.s32 1, %s3855_s18   ;;  %s5802_s23 = sld [smem:[#allocation10_spill]] }
 0x4af   : > { %p28_p4 = scmp.ge.s32.totalorder %s31_s18, 4   ;;  %s5803_s15 = sld [smem:[#allocation13_spill]] }
 0x4b0   : > { %s5804_s16 = sld [smem:[#allocation11_spill]]  ;;  %s5806_s29 = smov %s3839_s30 }
 0x4b1   : > { %s5805_s17 = sld [smem:[#allocation12_spill]]  ;;  %30 = sbr.rel (!%p28_p4) target bundleno = 16 (0x10), region = 160 }
 0x4b4   : > { %s5807_s30 = smov %s5802_s23 }
 0x4b6   :  { %2916 = vsyncpa [#allocation4], 1 }
 0x4b7   :  { %2918 = vsyncpa [#allocation4 + $0x1], 1 }
 0x4b8   :  { %2919 = vsyncpa [#allocation6], 1 }
 0x4b9   :  { %2921 = vsyncpa [#allocation6 + $0x1], 1 }

</bundles_post_ra>
